<compile_context>
chip_gen: v7x
topology: tpu7x:2x2x1
jax: 0.10.0
libtpu: 0.0.40
codegen_flags: <defaults>
</compile_context>

<pallas_src>
import jax
import jax.numpy as jnp
from jax import lax
from jax.experimental import pallas as pl
from jax.experimental.pallas import tpu as pltpu

# ---- config (mirrors TextRNN's config attributes) ----
VOCAB = 50        # vocabSize
EMBED = 32        # embedDimention
HIDDEN = 32       # hiddenSize
NUM_LAYERS = 1    # hiddenLayer
OUT = 4           # outputSize
BATCH = 2
SEQ = 8

# ---- kernel layout constants ----
VOCAB_PAD = 128   # one-hot lane width per direction (tokens < 50 < 128)
GRP = 128         # padded lanes per gate group; fwd gate @ [0:32), bwd @ [32:64)
GATES = 4 * GRP   # 512 : gate groups ordered [i | f | o | g]
H2 = 2 * HIDDEN   # 64  : [h_fwd | h_bwd]
SUB = 8           # sublane tile; batch rows live in sublanes 0..BATCH-1
OUT_PAD = 128     # lane-dense padded output width (sliced to OUT in wrapper)


def _textrnn_kernel(tok_f_ref,          # VMEM (T*8, 1) int32 fwd token ids (-1 = pad row)
                    tok_b_ref,          # VMEM (T*8, 1) int32 time-reversed token ids
                    table_ref,          # VMEM (2*VOCAB_PAD, GATES) pre-projected emb tables
                    whh_ref,            # VMEM (2H, GATES) block-structured hidden->gate
                    wfc_ref, bfc_ref,   # VMEM (2H, OUT_PAD), (1, OUT_PAD)
                    out_ref,            # VMEM (8, OUT_PAD)
                    xg_ref):            # VMEM scratch (T*8, GATES) gate pre-activations
    n_rows = tok_f_ref.shape[0]         # T * 8
    T = n_rows // SUB

    # ---- fused embedding gather + input->gate projection: one MXU matmul ----
    # one-hot rows built from lane-iota vs token id; pad rows (token = -1) are all-zero.
    lane = lax.broadcasted_iota(jnp.int32, (n_rows, VOCAB_PAD), 1)
    oh = jnp.concatenate(
        [(lane == tok_f_ref[...]).astype(jnp.float32),
         (lane == tok_b_ref[...]).astype(jnp.float32)],
        axis=1)                                                     # (T*8, 2*VOCAB_PAD)
    xg_ref[...] = jnp.dot(oh, table_ref[...],
                          preferred_element_type=jnp.float32)       # (T*8, GATES)

    # ---- fused fwd+bwd recurrence, fully unrolled (T static & small) ----
    # Gate groups are 128-lane padded: all slices below are vreg-aligned.
    whh = whh_ref[...]                                    # (2H, GATES), K = 64
    h64 = jnp.zeros((SUB, H2), jnp.float32)               # [h_fwd | h_bwd]
    c = jnp.zeros((SUB, GRP), jnp.float32)                # [c_fwd | c_bwd | pad]
    for t in range(T):
        x_t = xg_ref[t * SUB:(t + 1) * SUB, :]            # (8, GATES) aligned full tile
        if t == 0:
            gates = x_t                                   # h == 0: skip the matmul
        else:
            gates = x_t + jnp.dot(h64, whh, preferred_element_type=jnp.float32)
        sig = jax.nn.sigmoid(gates[:, 0:3 * GRP])         # contiguous [i | f | o]
        gg = jnp.tanh(gates[:, 3 * GRP:4 * GRP])          # [g]
        i_g = sig[:, 0:GRP]
        f_g = sig[:, GRP:2 * GRP]
        o_g = sig[:, 2 * GRP:3 * GRP]
        c = f_g * c + i_g * gg
        h = o_g * jnp.tanh(c)                             # (8, GRP), lanes 0:2H meaningful
        h64 = h[:, 0:H2]                                  # slice from lane 0: free

    # ---- final Linear: weights pre-permuted for [h_fwd | h_bwd], lane-padded ----
    out_ref[...] = (jnp.dot(h64, wfc_ref[...], preferred_element_type=jnp.float32)
                    + bfc_ref[...])


def init_params(key):
    """Raw (PyTorch-equivalent) parameters; gate column order [i, f, g, o]."""
    ks = jax.random.split(key, 10)
    s_lstm = 1.0 / jnp.sqrt(HIDDEN)
    s_fc = 1.0 / jnp.sqrt(2 * HIDDEN)

    def u(k, shape, s):
        return jax.random.uniform(k, shape, jnp.float32, -s, s)

    return {
        "embedding": jax.random.normal(ks[0], (VOCAB, EMBED), jnp.float32),
        "wih_f": u(ks[1], (EMBED, 4 * HIDDEN), s_lstm),
        "whh_f": u(ks[2], (HIDDEN, 4 * HIDDEN), s_lstm),
        "b_f":  u(ks[3], (1, 4 * HIDDEN), s_lstm),   # b_ih + b_hh combined
        "wih_b": u(ks[4], (EMBED, 4 * HIDDEN), s_lstm),
        "whh_b": u(ks[5], (HIDDEN, 4 * HIDDEN), s_lstm),
        "b_b":  u(ks[6], (1, 4 * HIDDEN), s_lstm),
        "wfc": u(ks[7], (2 * HIDDEN, OUT), s_fc),    # rows: [h_bwd block, h_fwd block]
        "bfc": u(ks[8], (1, OUT), s_fc),
    }


def _group_cols(w, dir_off):
    """(rows, 4H) in torch gate order [i,f,g,o] -> (rows, GATES) padded-group layout.

    Group order [i, f, o, g]; within each 128-lane group the direction's 32
    columns start at `dir_off` (0 = fwd, HIDDEN = bwd); everything else zero.
    """
    H = HIDDEN
    src = [slice(0, H), slice(H, 2 * H), slice(3 * H, 4 * H), slice(2 * H, 3 * H)]
    out = jnp.zeros((w.shape[0], GATES), jnp.float32)
    for g in range(4):
        out = out.at[:, g * GRP + dir_off: g * GRP + dir_off + H].set(w[:, src[g]])
    return out


def prepare_kernel_params(params):
    """One-time layout transform: pre-project embeddings, bake bias, pad & permute."""
    H = HIDDEN

    # combined bias in grouped layout (added once, via the fwd table)
    bias = _group_cols(params["b_f"], 0) + _group_cols(params["b_b"], H)     # (1, GATES)

    # pre-projected embedding tables: token -> gate pre-activation contribution
    table_f = _group_cols(params["embedding"] @ params["wih_f"], 0) + bias   # (VOCAB, GATES)
    table_b = _group_cols(params["embedding"] @ params["wih_b"], H)          # (VOCAB, GATES)
    table = jnp.zeros((2 * VOCAB_PAD, GATES), jnp.float32)
    table = table.at[0:VOCAB, :].set(table_f)
    table = table.at[VOCAB_PAD:VOCAB_PAD + VOCAB, :].set(table_b)

    # block-structured hidden->gate weights (fwd/bwd independent)
    whh = jnp.zeros((H2, GATES), jnp.float32)
    whh = whh.at[0:H, :].set(_group_cols(params["whh_f"], 0))
    whh = whh.at[H:2 * H, :].set(_group_cols(params["whh_b"], H))

    # FC: torch feat order is [h_bwd, h_fwd]; kernel h64 is [h_fwd | h_bwd]
    wfc = params["wfc"]
    wfc_k = jnp.zeros((H2, OUT_PAD), jnp.float32)
    wfc_k = wfc_k.at[0:H, 0:OUT].set(wfc[H:2 * H, :])
    wfc_k = wfc_k.at[H:2 * H, 0:OUT].set(wfc[0:H, :])
    bfc_k = jnp.zeros((1, OUT_PAD), jnp.float32).at[:, 0:OUT].set(params["bfc"])

    return {"table": table, "whh": whh, "wfc": wfc_k, "bfc": bfc_k}


def text_rnn_forward(tokens, kparams):
    B, T = tokens.shape
    # token-id layout plumbing (not compute): row r = t*SUB + b; pad rows get -1
    # so their one-hot rows are all-zero and the padded sublanes stay exactly 0.
    tok_f = jnp.full((T, SUB), -1, jnp.int32).at[:, :B].set(tokens.T).reshape(T * SUB, 1)
    tok_b = (jnp.full((T, SUB), -1, jnp.int32)
             .at[:, :B].set(tokens[:, ::-1].T).reshape(T * SUB, 1))

    vmem = pl.BlockSpec(memory_space=pltpu.MemorySpace.VMEM)
    out = pl.pallas_call(
        _textrnn_kernel,
        out_shape=jax.ShapeDtypeStruct((SUB, OUT_PAD), jnp.float32),
        in_specs=[vmem] * 6,
        out_specs=vmem,
        scratch_shapes=[pltpu.VMEM((T * SUB, GATES), jnp.float32)],
        # TODO(synk): for real serving batches, add a "parallel" grid axis over
        # request groups (2nd TensorCore on v7x) instead of one call per (2, 8).
    )(tok_f, tok_b, kparams["table"], kparams["whh"], kparams["wfc"], kparams["bfc"])
    return out[:B, :OUT]


def text_rnn_reference(tokens, params):
    """Pure-JAX reference of the same forward pass (raw param layout)."""
    emb = params["embedding"][tokens]            # (B, T, E)
    H = HIDDEN
    B, T = tokens.shape

    def cell(carry, x_t, wih, whh, b):
        h, c = carry
        gates = x_t @ wih + h @ whh + b
        i = jax.nn.sigmoid(gates[:, 0:H])
        f = jax.nn.sigmoid(gates[:, H:2 * H])
        g = jnp.tanh(gates[:, 2 * H:3 * H])
        o = jax.nn.sigmoid(gates[:, 3 * H:4 * H])
        c = f * c + i * g
        h = o * jnp.tanh(c)
        return (h, c)

    h0 = jnp.zeros((B, H), jnp.float32)
    c0 = jnp.zeros((B, H), jnp.float32)
    x_tbe = jnp.transpose(emb, (1, 0, 2))

    hf = (h0, c0)
    for t in range(T):
        hf = cell(hf, x_tbe[t], params["wih_f"], params["whh_f"], params["b_f"])
    hb = (h0, c0)
    for t in range(T - 1, -1, -1):
        hb = cell(hb, x_tbe[t], params["wih_b"], params["whh_b"], params["b_b"])

    feat = jnp.concatenate([hb[0], hf[0]], axis=1)   # torch.cat((h_n[-1], h_n[-2]))
    return feat @ params["wfc"] + params["bfc"]


if __name__ == "__main__":
    key = jax.random.PRNGKey(0)
    k_tok, k_param = jax.random.split(key)

    tokens = jax.random.randint(k_tok, (BATCH, SEQ), 0, VOCAB, dtype=jnp.int32)
    params = init_params(k_param)
    kparams = prepare_kernel_params(params)

    logits = jax.jit(text_rnn_forward)(tokens, kparams)
    logits = jax.block_until_ready(logits)

    ref = text_rnn_reference(tokens, params)
    assert logits.shape == (BATCH, OUT)
    assert jnp.allclose(logits, ref, atol=1e-4, rtol=1e-4), "mismatch vs JAX reference"

    print("KERNEL_OK")
</pallas_src>

<mosaic_0001>
module attributes {stable_mosaic.version = 11 : i64} {
  func.func @_textrnn_kernel(%arg0: memref<64x1xi32, #tpu.memory_space<vmem>>, %arg1: memref<64x1xi32, #tpu.memory_space<vmem>>, %arg2: memref<256x512xf32, #tpu.memory_space<vmem>>, %arg3: memref<64x512xf32, #tpu.memory_space<vmem>>, %arg4: memref<64x128xf32, #tpu.memory_space<vmem>>, %arg5: memref<1x128xf32, #tpu.memory_space<vmem>>, %arg6: memref<8x128xf32, #tpu.memory_space<vmem>>, %arg7: memref<64x512xf32, #tpu.memory_space<vmem>>) attributes {dimension_semantics = [], scalar_prefetch = 0 : i64, scratch_operands = 1 : i64, tpu.core_type = #tpu.core_type<tc>} {
    %0 = tpu.iota {dimensions = array<i32: 1>} : vector<64x128xi32>
    %c0 = arith.constant 0 : index
    %c0_0 = arith.constant 0 : index
    %1 = vector.load %arg0[%c0, %c0_0] : memref<64x1xi32, #tpu.memory_space<vmem>>, vector<64x1xi32>
    %2 = vector.broadcast %1 : vector<64x1xi32> to vector<64x128xi32>
    %3 = arith.cmpi eq, %0, %2 : vector<64x128xi32>
    %4 = arith.extui %3 : vector<64x128xi1> to vector<64x128xi32>
    %5 = arith.sitofp %4 : vector<64x128xi32> to vector<64x128xf32>
    %c0_1 = arith.constant 0 : index
    %c0_2 = arith.constant 0 : index
    %6 = vector.load %arg1[%c0_1, %c0_2] : memref<64x1xi32, #tpu.memory_space<vmem>>, vector<64x1xi32>
    %7 = vector.broadcast %6 : vector<64x1xi32> to vector<64x128xi32>
    %8 = arith.cmpi eq, %0, %7 : vector<64x128xi32>
    %9 = arith.extui %8 : vector<64x128xi1> to vector<64x128xi32>
    %10 = arith.sitofp %9 : vector<64x128xi32> to vector<64x128xf32>
    %11 = tpu.concatenate %5, %10 in 1 : vector<64x128xf32>, vector<64x128xf32> -> vector<64x256xf32>
    %c0_3 = arith.constant 0 : index
    %c0_4 = arith.constant 0 : index
    %12 = vector.load %arg2[%c0_3, %c0_4] : memref<256x512xf32, #tpu.memory_space<vmem>>, vector<256x512xf32>
    %cst = arith.constant dense<0.000000e+00> : vector<64x512xf32>
    %13 = tpu.matmul %11, %12, %cst {dimension_numbers = #tpu.dot_dimension_numbers<[1], [0], [0], [1], [0, 0, 1, 1], [], []>} : vector<64x256xf32>, vector<256x512xf32>, vector<64x512xf32> -> vector<64x512xf32>
    %c0_5 = arith.constant 0 : index
    %c0_6 = arith.constant 0 : index
    %14 = vector.load %arg7[%c0_5, %c0_6] : memref<64x512xf32, #tpu.memory_space<vmem>>, vector<64x512xf32>
    tpu.vector_store %arg7[%c0_5, %c0_6], %13 {strides = array<i32>} : memref<64x512xf32, #tpu.memory_space<vmem>>, vector<64x512xf32>,
    %c0_7 = arith.constant 0 : index
    %c0_8 = arith.constant 0 : index
    %15 = vector.load %arg3[%c0_7, %c0_8] : memref<64x512xf32, #tpu.memory_space<vmem>>, vector<64x512xf32>
    %cst_9 = arith.constant 0.000000e+00 : f32
    %16 = vector.broadcast %cst_9 : f32 to vector<8x128xf32>
    %c0_10 = arith.constant 0 : index
    %c0_11 = arith.constant 0 : index
    %17 = vector.load %arg7[%c0_10, %c0_11] : memref<64x512xf32, #tpu.memory_space<vmem>>, vector<8x512xf32>
    %18 = vector.extract_strided_slice %17 {offsets = [0, 0], sizes = [8, 384], strides = [1, 1]} : vector<8x512xf32> to vector<8x384xf32>
    %19 = arith.negf %18 : vector<8x384xf32>
    %20 = math.exp %19 : vector<8x384xf32>
    %cst_12 = arith.constant 1.000000e+00 : f32
    %21 = vector.broadcast %cst_12 : f32 to vector<8x384xf32>
    %22 = arith.addf %21, %20 : vector<8x384xf32>
    %23 = arith.divf %21, %22 : vector<8x384xf32>
    %24 = vector.extract_strided_slice %17 {offsets = [0, 384], sizes = [8, 128], strides = [1, 1]} : vector<8x512xf32> to vector<8x128xf32>
    %25 = math.tanh %24 : vector<8x128xf32>
    %26 = vector.extract_strided_slice %23 {offsets = [0, 0], sizes = [8, 128], strides = [1, 1]} : vector<8x384xf32> to vector<8x128xf32>
    %27 = vector.extract_strided_slice %23 {offsets = [0, 128], sizes = [8, 128], strides = [1, 1]} : vector<8x384xf32> to vector<8x128xf32>
    %28 = vector.extract_strided_slice %23 {offsets = [0, 256], sizes = [8, 128], strides = [1, 1]} : vector<8x384xf32> to vector<8x128xf32>
    %29 = arith.mulf %27, %16 : vector<8x128xf32>
    %30 = arith.mulf %26, %25 : vector<8x128xf32>
    %31 = arith.addf %29, %30 : vector<8x128xf32>
    %32 = math.tanh %31 : vector<8x128xf32>
    %33 = arith.mulf %28, %32 : vector<8x128xf32>
    %34 = vector.extract_strided_slice %33 {offsets = [0, 0], sizes = [8, 64], strides = [1, 1]} : vector<8x128xf32> to vector<8x64xf32>
    %c8 = arith.constant 8 : index
    %c0_13 = arith.constant 0 : index
    %35 = vector.load %arg7[%c8, %c0_13] : memref<64x512xf32, #tpu.memory_space<vmem>>, vector<8x512xf32>
    %cst_14 = arith.constant dense<0.000000e+00> : vector<8x512xf32>
    %36 = tpu.matmul %34, %15, %cst_14 {dimension_numbers = #tpu.dot_dimension_numbers<[1], [0], [0], [1], [0, 0, 1, 1], [], []>} : vector<8x64xf32>, vector<64x512xf32>, vector<8x512xf32> -> vector<8x512xf32>
    %37 = arith.addf %35, %36 : vector<8x512xf32>
    %38 = vector.extract_strided_slice %37 {offsets = [0, 0], sizes = [8, 384], strides = [1, 1]} : vector<8x512xf32> to vector<8x384xf32>
    %39 = arith.negf %38 : vector<8x384xf32>
    %40 = math.exp %39 : vector<8x384xf32>
    %cst_15 = arith.constant 1.000000e+00 : f32
    %41 = vector.broadcast %cst_15 : f32 to vector<8x384xf32>
    %42 = arith.addf %41, %40 : vector<8x384xf32>
    %43 = arith.divf %41, %42 : vector<8x384xf32>
    %44 = vector.extract_strided_slice %37 {offsets = [0, 384], sizes = [8, 128], strides = [1, 1]} : vector<8x512xf32> to vector<8x128xf32>
    %45 = math.tanh %44 : vector<8x128xf32>
    %46 = vector.extract_strided_slice %43 {offsets = [0, 0], sizes = [8, 128], strides = [1, 1]} : vector<8x384xf32> to vector<8x128xf32>
    %47 = vector.extract_strided_slice %43 {offsets = [0, 128], sizes = [8, 128], strides = [1, 1]} : vector<8x384xf32> to vector<8x128xf32>
    %48 = vector.extract_strided_slice %43 {offsets = [0, 256], sizes = [8, 128], strides = [1, 1]} : vector<8x384xf32> to vector<8x128xf32>
    %49 = arith.mulf %47, %31 : vector<8x128xf32>
    %50 = arith.mulf %46, %45 : vector<8x128xf32>
    %51 = arith.addf %49, %50 : vector<8x128xf32>
    %52 = math.tanh %51 : vector<8x128xf32>
    %53 = arith.mulf %48, %52 : vector<8x128xf32>
    %54 = vector.extract_strided_slice %53 {offsets = [0, 0], sizes = [8, 64], strides = [1, 1]} : vector<8x128xf32> to vector<8x64xf32>
    %c16 = arith.constant 16 : index
    %c0_16 = arith.constant 0 : index
    %55 = vector.load %arg7[%c16, %c0_16] : memref<64x512xf32, #tpu.memory_space<vmem>>, vector<8x512xf32>
    %cst_17 = arith.constant dense<0.000000e+00> : vector<8x512xf32>
    %56 = tpu.matmul %54, %15, %cst_17 {dimension_numbers = #tpu.dot_dimension_numbers<[1], [0], [0], [1], [0, 0, 1, 1], [], []>} : vector<8x64xf32>, vector<64x512xf32>, vector<8x512xf32> -> vector<8x512xf32>
    %57 = arith.addf %55, %56 : vector<8x512xf32>
    %58 = vector.extract_strided_slice %57 {offsets = [0, 0], sizes = [8, 384], strides = [1, 1]} : vector<8x512xf32> to vector<8x384xf32>
    %59 = arith.negf %58 : vector<8x384xf32>
    %60 = math.exp %59 : vector<8x384xf32>
    %cst_18 = arith.constant 1.000000e+00 : f32
    %61 = vector.broadcast %cst_18 : f32 to vector<8x384xf32>
    %62 = arith.addf %61, %60 : vector<8x384xf32>
    %63 = arith.divf %61, %62 : vector<8x384xf32>
    %64 = vector.extract_strided_slice %57 {offsets = [0, 384], sizes = [8, 128], strides = [1, 1]} : vector<8x512xf32> to vector<8x128xf32>
    %65 = math.tanh %64 : vector<8x128xf32>
    %66 = vector.extract_strided_slice %63 {offsets = [0, 0], sizes = [8, 128], strides = [1, 1]} : vector<8x384xf32> to vector<8x128xf32>
    %67 = vector.extract_strided_slice %63 {offsets = [0, 128], sizes = [8, 128], strides = [1, 1]} : vector<8x384xf32> to vector<8x128xf32>
    %68 = vector.extract_strided_slice %63 {offsets = [0, 256], sizes = [8, 128], strides = [1, 1]} : vector<8x384xf32> to vector<8x128xf32>
    %69 = arith.mulf %67, %51 : vector<8x128xf32>
    %70 = arith.mulf %66, %65 : vector<8x128xf32>
    %71 = arith.addf %69, %70 : vector<8x128xf32>
    %72 = math.tanh %71 : vector<8x128xf32>
    %73 = arith.mulf %68, %72 : vector<8x128xf32>
    %74 = vector.extract_strided_slice %73 {offsets = [0, 0], sizes = [8, 64], strides = [1, 1]} : vector<8x128xf32> to vector<8x64xf32>
    %c24 = arith.constant 24 : index
    %c0_19 = arith.constant 0 : index
    %75 = vector.load %arg7[%c24, %c0_19] : memref<64x512xf32, #tpu.memory_space<vmem>>, vector<8x512xf32>
    %cst_20 = arith.constant dense<0.000000e+00> : vector<8x512xf32>
    %76 = tpu.matmul %74, %15, %cst_20 {dimension_numbers = #tpu.dot_dimension_numbers<[1], [0], [0], [1], [0, 0, 1, 1], [], []>} : vector<8x64xf32>, vector<64x512xf32>, vector<8x512xf32> -> vector<8x512xf32>
    %77 = arith.addf %75, %76 : vector<8x512xf32>
    %78 = vector.extract_strided_slice %77 {offsets = [0, 0], sizes = [8, 384], strides = [1, 1]} : vector<8x512xf32> to vector<8x384xf32>
    %79 = arith.negf %78 : vector<8x384xf32>
    %80 = math.exp %79 : vector<8x384xf32>
    %cst_21 = arith.constant 1.000000e+00 : f32
    %81 = vector.broadcast %cst_21 : f32 to vector<8x384xf32>
    %82 = arith.addf %81, %80 : vector<8x384xf32>
    %83 = arith.divf %81, %82 : vector<8x384xf32>
    %84 = vector.extract_strided_slice %77 {offsets = [0, 384], sizes = [8, 128], strides = [1, 1]} : vector<8x512xf32> to vector<8x128xf32>
    %85 = math.tanh %84 : vector<8x128xf32>
    %86 = vector.extract_strided_slice %83 {offsets = [0, 0], sizes = [8, 128], strides = [1, 1]} : vector<8x384xf32> to vector<8x128xf32>
    %87 = vector.extract_strided_slice %83 {offsets = [0, 128], sizes = [8, 128], strides = [1, 1]} : vector<8x384xf32> to vector<8x128xf32>
    %88 = vector.extract_strided_slice %83 {offsets = [0, 256], sizes = [8, 128], strides = [1, 1]} : vector<8x384xf32> to vector<8x128xf32>
    %89 = arith.mulf %87, %71 : vector<8x128xf32>
    %90 = arith.mulf %86, %85 : vector<8x128xf32>
    %91 = arith.addf %89, %90 : vector<8x128xf32>
    %92 = math.tanh %91 : vector<8x128xf32>
    %93 = arith.mulf %88, %92 : vector<8x128xf32>
    %94 = vector.extract_strided_slice %93 {offsets = [0, 0], sizes = [8, 64], strides = [1, 1]} : vector<8x128xf32> to vector<8x64xf32>
    %c32 = arith.constant 32 : index
    %c0_22 = arith.constant 0 : index
    %95 = vector.load %arg7[%c32, %c0_22] : memref<64x512xf32, #tpu.memory_space<vmem>>, vector<8x512xf32>
    %cst_23 = arith.constant dense<0.000000e+00> : vector<8x512xf32>
    %96 = tpu.matmul %94, %15, %cst_23 {dimension_numbers = #tpu.dot_dimension_numbers<[1], [0], [0], [1], [0, 0, 1, 1], [], []>} : vector<8x64xf32>, vector<64x512xf32>, vector<8x512xf32> -> vector<8x512xf32>
    %97 = arith.addf %95, %96 : vector<8x512xf32>
    %98 = vector.extract_strided_slice %97 {offsets = [0, 0], sizes = [8, 384], strides = [1, 1]} : vector<8x512xf32> to vector<8x384xf32>
    %99 = arith.negf %98 : vector<8x384xf32>
    %100 = math.exp %99 : vector<8x384xf32>
    %cst_24 = arith.constant 1.000000e+00 : f32
    %101 = vector.broadcast %cst_24 : f32 to vector<8x384xf32>
    %102 = arith.addf %101, %100 : vector<8x384xf32>
    %103 = arith.divf %101, %102 : vector<8x384xf32>
    %104 = vector.extract_strided_slice %97 {offsets = [0, 384], sizes = [8, 128], strides = [1, 1]} : vector<8x512xf32> to vector<8x128xf32>
    %105 = math.tanh %104 : vector<8x128xf32>
    %106 = vector.extract_strided_slice %103 {offsets = [0, 0], sizes = [8, 128], strides = [1, 1]} : vector<8x384xf32> to vector<8x128xf32>
    %107 = vector.extract_strided_slice %103 {offsets = [0, 128], sizes = [8, 128], strides = [1, 1]} : vector<8x384xf32> to vector<8x128xf32>
    %108 = vector.extract_strided_slice %103 {offsets = [0, 256], sizes = [8, 128], strides = [1, 1]} : vector<8x384xf32> to vector<8x128xf32>
    %109 = arith.mulf %107, %91 : vector<8x128xf32>
    %110 = arith.mulf %106, %105 : vector<8x128xf32>
    %111 = arith.addf %109, %110 : vector<8x128xf32>
    %112 = math.tanh %111 : vector<8x128xf32>
    %113 = arith.mulf %108, %112 : vector<8x128xf32>
    %114 = vector.extract_strided_slice %113 {offsets = [0, 0], sizes = [8, 64], strides = [1, 1]} : vector<8x128xf32> to vector<8x64xf32>
    %c40 = arith.constant 40 : index
    %c0_25 = arith.constant 0 : index
    %115 = vector.load %arg7[%c40, %c0_25] : memref<64x512xf32, #tpu.memory_space<vmem>>, vector<8x512xf32>
    %cst_26 = arith.constant dense<0.000000e+00> : vector<8x512xf32>
    %116 = tpu.matmul %114, %15, %cst_26 {dimension_numbers = #tpu.dot_dimension_numbers<[1], [0], [0], [1], [0, 0, 1, 1], [], []>} : vector<8x64xf32>, vector<64x512xf32>, vector<8x512xf32> -> vector<8x512xf32>
    %117 = arith.addf %115, %116 : vector<8x512xf32>
    %118 = vector.extract_strided_slice %117 {offsets = [0, 0], sizes = [8, 384], strides = [1, 1]} : vector<8x512xf32> to vector<8x384xf32>
    %119 = arith.negf %118 : vector<8x384xf32>
    %120 = math.exp %119 : vector<8x384xf32>
    %cst_27 = arith.constant 1.000000e+00 : f32
    %121 = vector.broadcast %cst_27 : f32 to vector<8x384xf32>
    %122 = arith.addf %121, %120 : vector<8x384xf32>
    %123 = arith.divf %121, %122 : vector<8x384xf32>
    %124 = vector.extract_strided_slice %117 {offsets = [0, 384], sizes = [8, 128], strides = [1, 1]} : vector<8x512xf32> to vector<8x128xf32>
    %125 = math.tanh %124 : vector<8x128xf32>
    %126 = vector.extract_strided_slice %123 {offsets = [0, 0], sizes = [8, 128], strides = [1, 1]} : vector<8x384xf32> to vector<8x128xf32>
    %127 = vector.extract_strided_slice %123 {offsets = [0, 128], sizes = [8, 128], strides = [1, 1]} : vector<8x384xf32> to vector<8x128xf32>
    %128 = vector.extract_strided_slice %123 {offsets = [0, 256], sizes = [8, 128], strides = [1, 1]} : vector<8x384xf32> to vector<8x128xf32>
    %129 = arith.mulf %127, %111 : vector<8x128xf32>
    %130 = arith.mulf %126, %125 : vector<8x128xf32>
    %131 = arith.addf %129, %130 : vector<8x128xf32>
    %132 = math.tanh %131 : vector<8x128xf32>
    %133 = arith.mulf %128, %132 : vector<8x128xf32>
    %134 = vector.extract_strided_slice %133 {offsets = [0, 0], sizes = [8, 64], strides = [1, 1]} : vector<8x128xf32> to vector<8x64xf32>
    %c48 = arith.constant 48 : index
    %c0_28 = arith.constant 0 : index
    %135 = vector.load %arg7[%c48, %c0_28] : memref<64x512xf32, #tpu.memory_space<vmem>>, vector<8x512xf32>
    %cst_29 = arith.constant dense<0.000000e+00> : vector<8x512xf32>
    %136 = tpu.matmul %134, %15, %cst_29 {dimension_numbers = #tpu.dot_dimension_numbers<[1], [0], [0], [1], [0, 0, 1, 1], [], []>} : vector<8x64xf32>, vector<64x512xf32>, vector<8x512xf32> -> vector<8x512xf32>
    %137 = arith.addf %135, %136 : vector<8x512xf32>
    %138 = vector.extract_strided_slice %137 {offsets = [0, 0], sizes = [8, 384], strides = [1, 1]} : vector<8x512xf32> to vector<8x384xf32>
    %139 = arith.negf %138 : vector<8x384xf32>
    %140 = math.exp %139 : vector<8x384xf32>
    %cst_30 = arith.constant 1.000000e+00 : f32
    %141 = vector.broadcast %cst_30 : f32 to vector<8x384xf32>
    %142 = arith.addf %141, %140 : vector<8x384xf32>
    %143 = arith.divf %141, %142 : vector<8x384xf32>
    %144 = vector.extract_strided_slice %137 {offsets = [0, 384], sizes = [8, 128], strides = [1, 1]} : vector<8x512xf32> to vector<8x128xf32>
    %145 = math.tanh %144 : vector<8x128xf32>
    %146 = vector.extract_strided_slice %143 {offsets = [0, 0], sizes = [8, 128], strides = [1, 1]} : vector<8x384xf32> to vector<8x128xf32>
    %147 = vector.extract_strided_slice %143 {offsets = [0, 128], sizes = [8, 128], strides = [1, 1]} : vector<8x384xf32> to vector<8x128xf32>
    %148 = vector.extract_strided_slice %143 {offsets = [0, 256], sizes = [8, 128], strides = [1, 1]} : vector<8x384xf32> to vector<8x128xf32>
    %149 = arith.mulf %147, %131 : vector<8x128xf32>
    %150 = arith.mulf %146, %145 : vector<8x128xf32>
    %151 = arith.addf %149, %150 : vector<8x128xf32>
    %152 = math.tanh %151 : vector<8x128xf32>
    %153 = arith.mulf %148, %152 : vector<8x128xf32>
    %154 = vector.extract_strided_slice %153 {offsets = [0, 0], sizes = [8, 64], strides = [1, 1]} : vector<8x128xf32> to vector<8x64xf32>
    %c56 = arith.constant 56 : index
    %c0_31 = arith.constant 0 : index
    %155 = vector.load %arg7[%c56, %c0_31] : memref<64x512xf32, #tpu.memory_space<vmem>>, vector<8x512xf32>
    %cst_32 = arith.constant dense<0.000000e+00> : vector<8x512xf32>
    %156 = tpu.matmul %154, %15, %cst_32 {dimension_numbers = #tpu.dot_dimension_numbers<[1], [0], [0], [1], [0, 0, 1, 1], [], []>} : vector<8x64xf32>, vector<64x512xf32>, vector<8x512xf32> -> vector<8x512xf32>
    %157 = arith.addf %155, %156 : vector<8x512xf32>
    %158 = vector.extract_strided_slice %157 {offsets = [0, 0], sizes = [8, 384], strides = [1, 1]} : vector<8x512xf32> to vector<8x384xf32>
    %159 = arith.negf %158 : vector<8x384xf32>
    %160 = math.exp %159 : vector<8x384xf32>
    %cst_33 = arith.constant 1.000000e+00 : f32
    %161 = vector.broadcast %cst_33 : f32 to vector<8x384xf32>
    %162 = arith.addf %161, %160 : vector<8x384xf32>
    %163 = arith.divf %161, %162 : vector<8x384xf32>
    %164 = vector.extract_strided_slice %157 {offsets = [0, 384], sizes = [8, 128], strides = [1, 1]} : vector<8x512xf32> to vector<8x128xf32>
    %165 = math.tanh %164 : vector<8x128xf32>
    %166 = vector.extract_strided_slice %163 {offsets = [0, 0], sizes = [8, 128], strides = [1, 1]} : vector<8x384xf32> to vector<8x128xf32>
    %167 = vector.extract_strided_slice %163 {offsets = [0, 128], sizes = [8, 128], strides = [1, 1]} : vector<8x384xf32> to vector<8x128xf32>
    %168 = vector.extract_strided_slice %163 {offsets = [0, 256], sizes = [8, 128], strides = [1, 1]} : vector<8x384xf32> to vector<8x128xf32>
    %169 = arith.mulf %167, %151 : vector<8x128xf32>
    %170 = arith.mulf %166, %165 : vector<8x128xf32>
    %171 = arith.addf %169, %170 : vector<8x128xf32>
    %172 = math.tanh %171 : vector<8x128xf32>
    %173 = arith.mulf %168, %172 : vector<8x128xf32>
    %174 = vector.extract_strided_slice %173 {offsets = [0, 0], sizes = [8, 64], strides = [1, 1]} : vector<8x128xf32> to vector<8x64xf32>
    %c0_34 = arith.constant 0 : index
    %c0_35 = arith.constant 0 : index
    %175 = vector.load %arg4[%c0_34, %c0_35] : memref<64x128xf32, #tpu.memory_space<vmem>>, vector<64x128xf32>
    %cst_36 = arith.constant dense<0.000000e+00> : vector<8x128xf32>
    %176 = tpu.matmul %174, %175, %cst_36 {dimension_numbers = #tpu.dot_dimension_numbers<[1], [0], [0], [1], [0, 0, 1, 1], [], []>} : vector<8x64xf32>, vector<64x128xf32>, vector<8x128xf32> -> vector<8x128xf32>
    %c0_37 = arith.constant 0 : index
    %c0_38 = arith.constant 0 : index
    %177 = vector.load %arg5[%c0_37, %c0_38] : memref<1x128xf32, #tpu.memory_space<vmem>>, vector<1x128xf32>
    %178 = vector.broadcast %177 : vector<1x128xf32> to vector<8x128xf32>
    %179 = arith.addf %176, %178 : vector<8x128xf32>
    %c0_39 = arith.constant 0 : index
    %c0_40 = arith.constant 0 : index
    %180 = vector.load %arg6[%c0_39, %c0_40] : memref<8x128xf32, #tpu.memory_space<vmem>>, vector<8x128xf32>
    tpu.vector_store %arg6[%c0_39, %c0_40], %179 {strides = array<i32>} : memref<8x128xf32, #tpu.memory_space<vmem>>, vector<8x128xf32>,
    return
  }
}

</mosaic_0001>

<bundles_post_ra>
// kernel: text_rnn_forward.1
= control target key start
LH: loop header
LB: loop body
LE: loop exit
PB: predicated region body
PF: predicated region fallthrough
CT: control target
= control target key end

     0   :  { %11 = vsyncpa [#allocation4], 0  ;;  %s2979_s0 = inlined_call_operand.vmem [shape: s32[64,1], index: 0, kind: input, shape index: {}]   ;;  %s2980_s1 = inlined_call_operand.vmem [shape: s32[64,1], index: 1, kind: input, shape index: {}]   ;;  %s2981_s2 = inlined_call_operand.hbm [shape: f32[256,512], index: 2, kind: input, shape index: {}]   ;;  %s2982_s3 = inlined_call_operand.hbm [shape: f32[64,512], index: 3, kind: input, shape index: {}]   ;;  %s2983_s4 = inlined_call_operand.vmem [shape: f32[64,128], index: 4, kind: input, shape index: {}]   ;;  %s2984_s5 = inlined_call_operand.vmem [shape: f32[1,128], index: 5, kind: input, shape index: {}]   ;;  %s2985_s6 = inlined_call_operand.vmem [shape: f32[8,128], index: 6, kind: output, shape index: {}]  }
   0x1   :  { %12 = vsyncpa [#allocation6], 0  ;;  %s2641_s21 = smov [#allocation3]   ;;  %s2593_s25 = scalar_lea.hbm %s2981_s2, 16384 }
   0x2   :  { %s22_s22 = sshll.u32 %s2641_s21, 4  ;;  %p2594_p0 = scmp.ne.s32.totalorder %s2981_s2, %s2593_s25  ;;  %s23_s22 = int_to_ptr.vmem [resolvable:$true] %s22_s22 }
   0x3   :  { %p2597_p1 = scmp.lt.u32.totalorder %s2593_s25, %s2981_s2 }
   0x5   :  { %p2599_p2 = pnand %p2597_p1, %p2594_p0 }
   0x7   :  { %2602 = shalt.err (!%p2599_p2)
}
   0x8   :  { %s2603_s30 = scalar_lea.vmem %s23_s22, 16384  ;;  %p2608_p4 = scmp.lt.s32.totalorder %s23_s22, %s23_s22 }
   0x9   :  { %p2604_p3 = scmp.ne.s32.totalorder %s23_s22, %s2603_s30  ;;  %p2609_p5 = scmp.lt.s32.totalorder %s2603_s30, %s2603_s30 }
   0xb   :  { %p2610_p6 = por %p2609_p5, %p2608_p4 }
   0xd   :  { %p2611_p7 = pnand %p2610_p6, %p2604_p3 }
   0xf   :  { %2614 = shalt.err (!%p2611_p7)
}
  0x10   :  { %s2642_s7 = smov 512   ;;  %s2643_s8 = smov 32  }
  0x11   :  { %28 = dma.hbm_to_vmem [thread:$0]  %s2981_s2, 16384, %s23_s22, [#allocation4], %s2642_s7, %s2642_s7, %s2643_s8  }
  0x12   :  { %s2644_s11 = smov [#allocation5]   ;;  %s2615_s15 = scalar_lea.hbm %s2982_s3, 4096 }
  0x13   :  { %s34_s12 = sshll.u32 %s2644_s11, 4  ;;  %p2616_p8 = scmp.ne.s32.totalorder %s2982_s3, %s2615_s15  ;;  %s35_s12 = int_to_ptr.vmem [resolvable:$true] %s34_s12 }
  0x14   :  { %p2619_p9 = scmp.lt.u32.totalorder %s2615_s15, %s2982_s3 }
  0x16   :  { %p2621_p10 = pnand %p2619_p9, %p2616_p8 }
  0x18   :  { %2624 = shalt.err (!%p2621_p10)
}
  0x19   :  { %s2625_s20 = scalar_lea.vmem %s35_s12, 4096  ;;  %p2630_p12 = scmp.lt.s32.totalorder %s35_s12, %s35_s12 }
  0x1a   :  { %p2626_p11 = scmp.ne.s32.totalorder %s35_s12, %s2625_s20  ;;  %p2631_p13 = scmp.lt.s32.totalorder %s2625_s20, %s2625_s20 }
  0x1c   :  { %p2632_p0 = por %p2631_p13, %p2630_p12 }
  0x1e   :  { %p2633_p1 = pnand %p2632_p0, %p2626_p11 }
  0x20   :  { %2636 = shalt.err (!%p2633_p1)
}
  0x21   :  { %40 = dma.hbm_to_vmem [thread:$0]  %s2982_s3, 4096, %s35_s12, [#allocation6], %s2642_s7, %s2642_s7, %s2643_s8  }
  0x22   :  { %2637 = dma.done.wait [#allocation4], 16384  }
  0x23   :  { %2638 = vsyncadd [#allocation4], 4294950912 }
  0x24   :  { %2639 = dma.done.wait [#allocation6], 4096  }
  0x25   :  { %2640 = vsyncadd [#allocation6], 4294963200  ;;  %v2645_v0 = vmov 0   ;;  %v109_v1 = vld [vmem:[%s2980_s1] sm:$0xff]  ;;  %v110_v2 = vld [vmem:[%s2980_s1 + $0x8] sm:$0xff] }
  0x26   :  { %2463 = vset.pattern.permute.xlu0 %v2645_v0  ;;  %2464 = vset.pattern.permute.xlu1 %v2645_v0  ;;  %v53_v3 = vld [vmem:[%s2979_s0] sm:$0xff]  ;;  %v54_v4 = vld [vmem:[%s2979_s0 + $0x8] sm:$0xff]  ;;  %v111_v5 = vld [vmem:[%s2980_s1 + $0x10] sm:$0xff] }
  0x27   :  { %118 = vperm.xlu0 %2463, %v109_v1   ;;  %121 = vperm.xlu1 %2464, %v110_v2   ;;  %v55_v6 = vld [vmem:[%s2979_s0 + $0x10] sm:$0xff]  ;;  %v166_v7 = vld [vmem:[#allocation3 + $0x8] sm:$0xff]  ;;  %v168_v9 = vld [vmem:[#allocation3 + $0x18] sm:$0xff] }
  0x28   :  { %v170_v8 = vld [vmem:[#allocation3 + $0x28] sm:$0xff]  ;;  %v172_v11 = vld [vmem:[#allocation3 + $0x38] sm:$0xff]  ;;  %v165_v12 = vld [vmem:[#allocation3] sm:$0xff] }
  0x29   :  { %v2062_v10 = vpack.c.bf16 %v170_v8, %v166_v7  ;;  %v169_v13 = vld [vmem:[#allocation3 + $0x20] sm:$0xff]  ;;  %v2126_v14 = vpack.c.bf16 %v172_v11, %v168_v9  ;;  %v167_v16 = vld [vmem:[#allocation3 + $0x10] sm:$0xff]  ;;  %v174_v18 = vld [vmem:[#allocation3 + $0x48] sm:$0xff] }
  0x2a   :  { %v2064_v15 = vpack.c.bf16 %v169_v13, %v165_v12  ;;  %v171_v17 = vld [vmem:[#allocation3 + $0x30] sm:$0xff]  ;;  %v112_v19 = vld [vmem:[%s2980_s1 + $0x18] sm:$0xff]  ;;  %v178_v22 = vld [vmem:[#allocation3 + $0x68] sm:$0xff] }
  0x2b   :  { %62 = vperm.xlu0 %2463, %v53_v3   ;;  %65 = vperm.xlu1 %2464, %v54_v4   ;;  %v56_v20 = vld [vmem:[%s2979_s0 + $0x18] sm:$0xff]  ;;  %v2128_v21 = vpack.c.bf16 %v171_v17, %v167_v16  ;;  %v2066_v25 = vpack.c.bf16 %v178_v22, %v174_v18  ;;  %v173_v27 = vld [vmem:[#allocation3 + $0x40] sm:$0xff]  ;;  %v175_v29 = vld [vmem:[#allocation3 + $0x50] sm:$0xff] }
  0x2c   :  { %2063 = vmatprep.subr.bf16.mxu0 %v2062_v10  ;;  %v176_v23 = vld [vmem:[#allocation3 + $0x58] sm:$0xff]  ;;  %v177_v28 = vld [vmem:[#allocation3 + $0x60] sm:$0xff]  ;;  %2127 = vmatprep.subr.bf16.mxu1 %v2126_v14  ;;  %v179_v31 = vld [vmem:[#allocation3 + $0x70] sm:$0xff] }
  0x2d   :  { %v180_v24 = vld [vmem:[#allocation3 + $0x78] sm:$0xff]  ;;  %2065 = vmatpush1.bf16.msra.mxu0 %v2064_v15  ;;  %v2068_v30 = vpack.c.bf16 %v177_v28, %v173_v27  ;;  %v182_v32 = vld [vmem:[#allocation3 + $0x88] sm:$0xff]  ;;  %2129 = vmatpush1.bf16.msra.mxu1 %v2128_v21  ;;  %v2132_v34 = vpack.c.bf16 %v179_v31, %v175_v29  ;;  %v181_v38 = vld [vmem:[#allocation3 + $0x80] sm:$0xff] }
  0x2e   :  { %v2130_v26 = vpack.c.bf16 %v180_v24, %v176_v23  ;;  %v186_v33 = vld [vmem:[#allocation3 + $0xa8] sm:$0xff]  ;;  %2067 = vmatprep.subr.bf16.mxu0 %v2066_v25  ;;  %v184_v36 = vld [vmem:[#allocation3 + $0x98] sm:$0xff]  ;;  %v185_v40 = vld [vmem:[#allocation3 + $0xa0] sm:$0xff] }
  0x2f   :  { %124 = vperm.xlu0 %2463, %v111_v5   ;;  %68 = vperm.xlu1 %2464, %v55_v6   ;;  %v2070_v35 = vpack.c.bf16 %v186_v33, %v182_v32  ;;  %v188_v37 = vld [vmem:[#allocation3 + $0xb8] sm:$0xff]  ;;  %v183_v41 = vld [vmem:[#allocation3 + $0x90] sm:$0xff]  ;;  %v190_v43 = vld [vmem:[#allocation3 + $0xc8] sm:$0xff]  ;;  %v2072_v48 = vpack.c.bf16 %v185_v40, %v181_v38 }
  0x30   :  { %2131 = vmatprep.subr.bf16.mxu1 %v2130_v26  ;;  %v2134_v39 = vpack.c.bf16 %v188_v37, %v184_v36  ;;  %v187_v42 = vld [vmem:[#allocation3 + $0xb0] sm:$0xff]  ;;  %v194_v44 = vld [vmem:[#allocation3 + $0xe8] sm:$0xff]  ;;  %v192_v45 = vld [vmem:[#allocation3 + $0xd8] sm:$0xff] }
  0x31   :  { %v113_v46 = vld [vmem:[%s2980_s1 + $0x20] sm:$0xff]  ;;  %2069 = vmatpush1.bf16.msra.mxu0 %v2068_v30  ;;  %v196_v49 = vld [vmem:[#allocation3 + $0xf8] sm:$0xff]  ;;  %2133 = vmatpush1.bf16.msra.mxu1 %v2132_v34  ;;  %v2136_v50 = vpack.c.bf16 %v187_v42, %v183_v41  ;;  %v2074_v51 = vpack.c.bf16 %v194_v44, %v190_v43  ;;  %v191_v54 = vld [vmem:[#allocation3 + $0xd0] sm:$0xff] }
  0x32   :  { %v57_v47 = vld [vmem:[%s2979_s0 + $0x20] sm:$0xff]  ;;  %2071 = vmatprep.subr.bf16.mxu0 %v2070_v35  ;;  %2135 = vmatprep.subr.bf16.mxu1 %v2134_v39  ;;  %v2138_v55 = vpack.c.bf16 %v196_v49, %v192_v45  ;;  %v195_v56 = vld [vmem:[#allocation3 + $0xf0] sm:$0xff]  ;;  %v198_v57 = vld [vmem:[#allocation3 + $0x108] sm:$0xff] }
  0x33   :  { %127 = vperm.xlu0 %2463, %v112_v19   ;;  %71 = vperm.xlu1 %2464, %v56_v20   ;;  %v189_v52 = vld [vmem:[#allocation3 + $0xc0] sm:$0xff]  ;;  %v202_v58 = vld [vmem:[#allocation3 + $0x128] sm:$0xff]  ;;  %v200_v59 = vld [vmem:[#allocation3 + $0x118] sm:$0xff]  ;;  %v2140_v0 = vpack.c.bf16 %v195_v56, %v191_v54 }
  0x34   :  { %v193_v53 = vld [vmem:[#allocation3 + $0xe0] sm:$0xff]  ;;  %v204_v60 = vld [vmem:[#allocation3 + $0x138] sm:$0xff]  ;;  %v114_v61 = vld [vmem:[%s2980_s1 + $0x28] sm:$0xff]  ;;  %v2078_v1 = vpack.c.bf16 %v202_v58, %v198_v57 }
  0x35   :  { %v58_v62 = vld [vmem:[%s2979_s0 + $0x28] sm:$0xff]  ;;  %2073 = vmatpush1.bf16.msra.mxu0 %v2072_v48  ;;  %v2076_v63 = vpack.c.bf16 %v193_v53, %v189_v52  ;;  %2137 = vmatpush1.bf16.msra.mxu1 %v2136_v50  ;;  %v197_v2 = vld [vmem:[#allocation3 + $0x100] sm:$0xff]  ;;  %v199_v4 = vld [vmem:[#allocation3 + $0x110] sm:$0xff]  ;;  %v2142_v5 = vpack.c.bf16 %v204_v60, %v200_v59 }
  0x36   :  { %2075 = vmatprep.subr.bf16.mxu0 %v2074_v51  ;;  %v201_v3 = vld [vmem:[#allocation3 + $0x120] sm:$0xff]  ;;  %2139 = vmatprep.subr.bf16.mxu1 %v2138_v55  ;;  %v203_v6 = vld [vmem:[#allocation3 + $0x130] sm:$0xff]  ;;  %v206_v7 = vld [vmem:[#allocation3 + $0x148] sm:$0xff] }
  0x37   :  { %130 = vperm.xlu0 %2463, %v113_v46   ;;  %74 = vperm.xlu1 %2464, %v57_v47   ;;  %v210_v8 = vld [vmem:[#allocation3 + $0x168] sm:$0xff]  ;;  %v208_v9 = vld [vmem:[#allocation3 + $0x158] sm:$0xff]  ;;  %v115_v11 = vld [vmem:[%s2980_s1 + $0x30] sm:$0xff]  ;;  %v2080_v13 = vpack.c.bf16 %v201_v3, %v197_v2  ;;  %v2144_v14 = vpack.c.bf16 %v203_v6, %v199_v4 }
  0x38   :  { %v212_v10 = vld [vmem:[#allocation3 + $0x178] sm:$0xff]  ;;  %v59_v12 = vld [vmem:[%s2979_s0 + $0x30] sm:$0xff]  ;;  %v2082_v15 = vpack.c.bf16 %v210_v8, %v206_v7  ;;  %v205_v16 = vld [vmem:[#allocation3 + $0x140] sm:$0xff] }
  0x39   :  { %2077 = vmatpush1.bf16.msra.mxu0 %v2076_v63  ;;  %2141 = vmatpush1.bf16.msra.mxu1 %v2140_v0  ;;  %v209_v17 = vld [vmem:[#allocation3 + $0x160] sm:$0xff]  ;;  %v207_v18 = vld [vmem:[#allocation3 + $0x150] sm:$0xff]  ;;  %v2146_v19 = vpack.c.bf16 %v212_v10, %v208_v9  ;;  %v214_v21 = vld [vmem:[#allocation3 + $0x188] sm:$0xff] }
  0x3a   :  { %2079 = vmatprep.subr.bf16.mxu0 %v2078_v1  ;;  %2143 = vmatprep.subr.bf16.mxu1 %v2142_v5  ;;  %v211_v20 = vld [vmem:[#allocation3 + $0x170] sm:$0xff]  ;;  %v218_v22 = vld [vmem:[#allocation3 + $0x1a8] sm:$0xff]  ;;  %v216_v23 = vld [vmem:[#allocation3 + $0x198] sm:$0xff]  ;;  %v2084_v26 = vpack.c.bf16 %v209_v17, %v205_v16 }
  0x3b   :  { %133 = vperm.xlu0 %2463, %v114_v61   ;;  %77 = vperm.xlu1 %2464, %v58_v62   ;;  %v220_v24 = vld [vmem:[#allocation3 + $0x1b8] sm:$0xff]  ;;  %v2148_v27 = vpack.c.bf16 %v211_v20, %v207_v18  ;;  %v2086_v28 = vpack.c.bf16 %v218_v22, %v214_v21  ;;  %v213_v29 = vld [vmem:[#allocation3 + $0x180] sm:$0xff]  ;;  %v215_v31 = vld [vmem:[#allocation3 + $0x190] sm:$0xff] }
  0x3c   :  { %v116_v25 = vld [vmem:[%s2980_s1 + $0x38] sm:$0xff]  ;;  %v217_v30 = vld [vmem:[#allocation3 + $0x1a0] sm:$0xff]  ;;  %v2150_v32 = vpack.c.bf16 %v220_v24, %v216_v23  ;;  %v219_v33 = vld [vmem:[#allocation3 + $0x1b0] sm:$0xff] }
  0x3d   :  { %2081 = vmatpush1.bf16.msra.mxu0 %v2080_v13  ;;  %2145 = vmatpush1.bf16.msra.mxu1 %v2144_v14  ;;  %v222_v34 = vld [vmem:[#allocation3 + $0x1c8] sm:$0xff]  ;;  %v224_v36 = vld [vmem:[#allocation3 + $0x1d8] sm:$0xff]  ;;  %v2088_v38 = vpack.c.bf16 %v217_v30, %v213_v29  ;;  %v2152_v39 = vpack.c.bf16 %v219_v33, %v215_v31  ;;  %v221_v41 = vld [vmem:[#allocation3 + $0x1c0] sm:$0xff] }
  0x3e   :  { %2083 = vmatprep.subr.bf16.mxu0 %v2082_v15  ;;  %2147 = vmatprep.subr.bf16.mxu1 %v2146_v19  ;;  %v226_v35 = vld [vmem:[#allocation3 + $0x1e8] sm:$0xff]  ;;  %v228_v37 = vld [vmem:[#allocation3 + $0x1f8] sm:$0xff]  ;;  %v225_v42 = vld [vmem:[#allocation3 + $0x1e0] sm:$0xff] }
  0x3f   :  { %136 = vperm.xlu0 %2463, %v115_v11   ;;  %80 = vperm.xlu1 %2464, %v59_v12   ;;  %v2090_v40 = vpack.c.bf16 %v226_v35, %v222_v34  ;;  %v223_v43 = vld [vmem:[#allocation3 + $0x1d0] sm:$0xff]  ;;  %v2154_v44 = vpack.c.bf16 %v228_v37, %v224_v36  ;;  %v230_v46 = vld [vmem:[#allocation3 + $0x208] sm:$0xff]  ;;  %v232_v48 = vld [vmem:[#allocation3 + $0x218] sm:$0xff]  ;;  %v2092_v50 = vpack.c.bf16 %v225_v42, %v221_v41 }
  0x40   :  { %v227_v45 = vld [vmem:[#allocation3 + $0x1f0] sm:$0xff]  ;;  %v234_v47 = vld [vmem:[#allocation3 + $0x228] sm:$0xff]  ;;  %v236_v49 = vld [vmem:[#allocation3 + $0x238] sm:$0xff] }
  0x41   :  { %2085 = vmatpush1.bf16.msra.mxu0 %v2084_v26  ;;  %2149 = vmatpush1.bf16.msra.mxu1 %v2148_v27  ;;  %v2156_v51 = vpack.c.bf16 %v227_v45, %v223_v43  ;;  %v2094_v52 = vpack.c.bf16 %v234_v47, %v230_v46  ;;  %v229_v53 = vld [vmem:[#allocation3 + $0x200] sm:$0xff]  ;;  %v231_v55 = vld [vmem:[#allocation3 + $0x210] sm:$0xff]  ;;  %v2158_v56 = vpack.c.bf16 %v236_v49, %v232_v48  ;;  %v238_v58 = vld [vmem:[#allocation3 + $0x248] sm:$0xff] }
  0x42   :  { %2087 = vmatprep.subr.bf16.mxu0 %v2086_v28  ;;  %2151 = vmatprep.subr.bf16.mxu1 %v2150_v32  ;;  %v233_v54 = vld [vmem:[#allocation3 + $0x220] sm:$0xff]  ;;  %v235_v57 = vld [vmem:[#allocation3 + $0x230] sm:$0xff]  ;;  %v242_v59 = vld [vmem:[#allocation3 + $0x268] sm:$0xff] }
  0x43   :  { %139 = vperm.xlu0 %2463, %v116_v25   ;;  %v240_v60 = vld [vmem:[#allocation3 + $0x258] sm:$0xff]  ;;  %v2096_v62 = vpack.c.bf16 %v233_v54, %v229_v53  ;;  %v2160_v63 = vpack.c.bf16 %v235_v57, %v231_v55  ;;  %v2098_v0 = vpack.c.bf16 %v242_v59, %v238_v58  ;;  %v237_v1 = vld [vmem:[#allocation3 + $0x240] sm:$0xff]  ;;  %v239_v3 = vld [vmem:[#allocation3 + $0x250] sm:$0xff] }
  0x44   :  { %v244_v61 = vld [vmem:[#allocation3 + $0x278] sm:$0xff]  ;;  %v241_v2 = vld [vmem:[#allocation3 + $0x260] sm:$0xff]  ;;  %v243_v5 = vld [vmem:[#allocation3 + $0x270] sm:$0xff] }
  0x45   :  { %2089 = vmatpush1.bf16.msra.mxu0 %v2088_v38  ;;  %2153 = vmatpush1.bf16.msra.mxu1 %v2152_v39  ;;  %v2162_v4 = vpack.c.bf16 %v244_v61, %v240_v60  ;;  %v246_v6 = vld [vmem:[#allocation3 + $0x288] sm:$0xff]  ;;  %v248_v8 = vld [vmem:[#allocation3 + $0x298] sm:$0xff]  ;;  %v2100_v10 = vpack.c.bf16 %v241_v2, %v237_v1  ;;  %v2164_v11 = vpack.c.bf16 %v243_v5, %v239_v3  ;;  %v245_v13 = vld [vmem:[#allocation3 + $0x280] sm:$0xff] }
  0x46   :  { %2091 = vmatprep.subr.bf16.mxu0 %v2090_v40  ;;  %2155 = vmatprep.subr.bf16.mxu1 %v2154_v44  ;;  %v250_v7 = vld [vmem:[#allocation3 + $0x2a8] sm:$0xff]  ;;  %v252_v9 = vld [vmem:[#allocation3 + $0x2b8] sm:$0xff]  ;;  %v249_v14 = vld [vmem:[#allocation3 + $0x2a0] sm:$0xff] }
  0x47   :  { %v2102_v12 = vpack.c.bf16 %v250_v7, %v246_v6  ;;  %v247_v15 = vld [vmem:[#allocation3 + $0x290] sm:$0xff]  ;;  %v2166_v16 = vpack.c.bf16 %v252_v9, %v248_v8  ;;  %v254_v18 = vld [vmem:[#allocation3 + $0x2c8] sm:$0xff]  ;;  %v256_v20 = vld [vmem:[#allocation3 + $0x2d8] sm:$0xff]  ;;  %v2104_v22 = vpack.c.bf16 %v249_v14, %v245_v13 }
  0x48   :  { %v251_v17 = vld [vmem:[#allocation3 + $0x2b0] sm:$0xff]  ;;  %v258_v19 = vld [vmem:[#allocation3 + $0x2e8] sm:$0xff]  ;;  %v260_v21 = vld [vmem:[#allocation3 + $0x2f8] sm:$0xff] }
  0x49   :  { %2093 = vmatpush1.bf16.msra.mxu0 %v2092_v50  ;;  %2157 = vmatpush1.bf16.msra.mxu1 %v2156_v51  ;;  %v253_v23 = vld [vmem:[#allocation3 + $0x2c0] sm:$0xff]  ;;  %v2168_v24 = vpack.c.bf16 %v251_v17, %v247_v15  ;;  %v2106_v25 = vpack.c.bf16 %v258_v19, %v254_v18  ;;  %v255_v27 = vld [vmem:[#allocation3 + $0x2d0] sm:$0xff]  ;;  %v60_v28 = vld [vmem:[%s2979_s0 + $0x38] sm:$0xff]  ;;  %v2170_v29 = vpack.c.bf16 %v260_v21, %v256_v20  ;;  %v51_v17 = vlaneseq }
  0x4a   :  { %2095 = vmatprep.subr.bf16.mxu0 %v2094_v52  ;;  %2159 = vmatprep.subr.bf16.mxu1 %v2158_v56  ;;  %v257_v26 = vld [vmem:[#allocation3 + $0x2e0] sm:$0xff]  ;;  %v259_v30 = vld [vmem:[#allocation3 + $0x2f0] sm:$0xff]  ;;  %v262_v31 = vld [vmem:[#allocation3 + $0x308] sm:$0xff]  ;;  %v2646_v21 = vmov 1.0  }
  0x4b   :  { %v266_v32 = vld [vmem:[#allocation3 + $0x328] sm:$0xff]  ;;  %83 = vperm.xlu1 %2464, %v60_v28   ;;  %v264_v33 = vld [vmem:[#allocation3 + $0x318] sm:$0xff]  ;;  %v2108_v35 = vpack.c.bf16 %v257_v26, %v253_v23  ;;  %v2172_v36 = vpack.c.bf16 %v259_v30, %v255_v27  ;;  %v261_v38 = vld [vmem:[#allocation3 + $0x300] sm:$0xff]  ;;  %v2757_v18 = vand.u32 127, %v51_v17 }
  0x4c   :  { %v268_v34 = vld [vmem:[#allocation3 + $0x338] sm:$0xff]  ;;  %v2110_v37 = vpack.c.bf16 %v266_v32, %v262_v31  ;;  %v265_v39 = vld [vmem:[#allocation3 + $0x320] sm:$0xff]  ;;  %v263_v40 = vld [vmem:[#allocation3 + $0x310] sm:$0xff] }
  0x4d   :  { %2097 = vmatpush1.bf16.msra.mxu0 %v2096_v62  ;;  %2161 = vmatpush1.bf16.msra.mxu1 %v2160_v63  ;;  %v2174_v41 = vpack.c.bf16 %v268_v34, %v264_v33  ;;  %v267_v42 = vld [vmem:[#allocation3 + $0x330] sm:$0xff]  ;;  %v270_v43 = vld [vmem:[#allocation3 + $0x348] sm:$0xff]  ;;  %v272_v45 = vld [vmem:[#allocation3 + $0x358] sm:$0xff]  ;;  %v2112_v47 = vpack.c.bf16 %v265_v39, %v261_v38 }
  0x4e   :  { %2099 = vmatprep.subr.bf16.mxu0 %v2098_v0  ;;  %2163 = vmatprep.subr.bf16.mxu1 %v2162_v4  ;;  %v274_v44 = vld [vmem:[#allocation3 + $0x368] sm:$0xff]  ;;  %v276_v46 = vld [vmem:[#allocation3 + $0x378] sm:$0xff]  ;;  %v2176_v48 = vpack.c.bf16 %v267_v42, %v263_v40  ;;  %v269_v50 = vld [vmem:[#allocation3 + $0x340] sm:$0xff] }
  0x4f   :  { %v2114_v49 = vpack.c.bf16 %v274_v44, %v270_v43  ;;  %v273_v51 = vld [vmem:[#allocation3 + $0x360] sm:$0xff]  ;;  %v271_v52 = vld [vmem:[#allocation3 + $0x350] sm:$0xff]  ;;  %v2178_v53 = vpack.c.bf16 %v276_v46, %v272_v45  ;;  %v278_v55 = vld [vmem:[#allocation3 + $0x388] sm:$0xff] }
  0x50   :  { %v275_v54 = vld [vmem:[#allocation3 + $0x370] sm:$0xff]  ;;  %v282_v56 = vld [vmem:[#allocation3 + $0x3a8] sm:$0xff]  ;;  %v280_v57 = vld [vmem:[#allocation3 + $0x398] sm:$0xff]  ;;  %v2116_v59 = vpack.c.bf16 %v273_v51, %v269_v50 }
  0x51   :  { %2101 = vmatpush1.bf16.msra.mxu0 %v2100_v10  ;;  %2165 = vmatpush1.bf16.msra.mxu1 %v2164_v11  ;;  %v284_v58 = vld [vmem:[#allocation3 + $0x3b8] sm:$0xff]  ;;  %v2180_v60 = vpack.c.bf16 %v275_v54, %v271_v52  ;;  %v2118_v61 = vpack.c.bf16 %v282_v56, %v278_v55  ;;  %v277_v62 = vld [vmem:[#allocation3 + $0x380] sm:$0xff]  ;;  %v279_v0 = vld [vmem:[#allocation3 + $0x390] sm:$0xff] }
  0x52   :  { %2103 = vmatprep.subr.bf16.mxu0 %v2102_v12  ;;  %2167 = vmatprep.subr.bf16.mxu1 %v2166_v16  ;;  %v281_v63 = vld [vmem:[#allocation3 + $0x3a0] sm:$0xff]  ;;  %v2182_v1 = vpack.c.bf16 %v284_v58, %v280_v57  ;;  %v283_v2 = vld [vmem:[#allocation3 + $0x3b0] sm:$0xff]  ;;  %v286_v3 = vld [vmem:[#allocation3 + $0x3c8] sm:$0xff] }
  0x53   :  { %v290_v4 = vld [vmem:[#allocation3 + $0x3e8] sm:$0xff]  ;;  %v288_v5 = vld [vmem:[#allocation3 + $0x3d8] sm:$0xff]  ;;  %v2120_v7 = vpack.c.bf16 %v281_v63, %v277_v62  ;;  %v2184_v8 = vpack.c.bf16 %v283_v2, %v279_v0  ;;  %v285_v10 = vld [vmem:[#allocation3 + $0x3c0] sm:$0xff]  ;;  %v2647_v0 = vmov 0.0  }
  0x54   :  { %v292_v6 = vld [vmem:[#allocation3 + $0x3f8] sm:$0xff]  ;;  %v2122_v9 = vpack.c.bf16 %v290_v4, %v286_v3  ;;  %v289_v11 = vld [vmem:[#allocation3 + $0x3e0] sm:$0xff]  ;;  %v287_v13 = vld [vmem:[#allocation3 + $0x3d0] sm:$0xff] }
  0x55   :  { %2105 = vmatpush1.bf16.msra.mxu0 %v2104_v22  ;;  %2169 = vmatpush1.bf16.msra.mxu1 %v2168_v24  ;;  %v2186_v12 = vpack.c.bf16 %v292_v6, %v288_v5  ;;  %v291_v14 = vld [vmem:[#allocation3 + $0x3f0] sm:$0xff]  ;;  %v2124_v15 = vpack.c.bf16 %v289_v11, %v285_v10  ;;  %v554_v38 = vld [vmem:[#allocation5 + $0x18] sm:$0xff]  ;;  %v551_v40 = vld [vmem:[#allocation5] sm:$0xff] }
  0x56   :  { %2107 = vmatprep.subr.bf16.mxu0 %v2106_v25  ;;  %2171 = vmatprep.subr.bf16.mxu1 %v2170_v29  ;;  %v2188_v16 = vpack.c.bf16 %v291_v14, %v287_v13  ;;  %v558_v42 = vld [vmem:[#allocation5 + $0x38] sm:$0xff]  ;;  %v553_v45 = vld [vmem:[#allocation5 + $0x10] sm:$0xff]  ;;  %v559_v52 = vld [vmem:[#allocation5 + $0x40] sm:$0xff] }
  0x57   :  { %v2779_v44 = vpack.c.bf16 %v558_v42, %v554_v38  ;;  %v557_v46 = vld [vmem:[#allocation5 + $0x30] sm:$0xff]  ;;  %v562_v50 = vld [vmem:[#allocation5 + $0x58] sm:$0xff]  ;;  %v568_v56 = vld [vmem:[#allocation5 + $0x88] sm:$0xff] }
  0x58   :  { %v566_v54 = vld [vmem:[#allocation5 + $0x78] sm:$0xff]  ;;  %v572_v57 = vld [vmem:[#allocation5 + $0xa8] sm:$0xff]  ;;  %v567_v58 = vld [vmem:[#allocation5 + $0x80] sm:$0xff] }
  0x59   :  { %2109 = vmatpush1.bf16.msra.mxu0 %v2108_v35  ;;  %2173 = vmatpush1.bf16.msra.mxu1 %v2172_v36  ;;  %v552_v36 = vld [vmem:[#allocation5 + $0x8] sm:$0xff]  ;;  %v561_v62 = vld [vmem:[#allocation5 + $0x50] sm:$0xff]  ;;  %v575_v5 = vld [vmem:[#allocation5 + $0xc0] sm:$0xff] }
  0x5a   :  { %2111 = vmatprep.subr.bf16.mxu0 %v2110_v37  ;;  %2175 = vmatprep.subr.bf16.mxu1 %v2174_v41  ;;  %v556_v37 = vld [vmem:[#allocation5 + $0x28] sm:$0xff]  ;;  %v555_v41 = vld [vmem:[#allocation5 + $0x20] sm:$0xff]  ;;  %v565_v63 = vld [vmem:[#allocation5 + $0x70] sm:$0xff] }
  0x5b   :  { %v2775_v39 = vpack.c.bf16 %v556_v37, %v552_v36  ;;  %v2777_v43 = vpack.c.bf16 %v555_v41, %v551_v40  ;;  %v2801_v2 = vpack.c.bf16 %v565_v63, %v561_v62  ;;  %v576_v3 = vld [vmem:[#allocation5 + $0xc8] sm:$0xff]  ;;  %v569_v11 = vld [vmem:[#allocation5 + $0x90] sm:$0xff]  ;;  %v578_v13 = vld [vmem:[#allocation5 + $0xd8] sm:$0xff] }
  0x5c   :  { %v580_v4 = vld [vmem:[#allocation5 + $0xe8] sm:$0xff]  ;;  %v581_v17 = vld [vmem:[#allocation5 + $0xf0] sm:$0xff] }
  0x5d   :  { %2113 = vmatpush1.bf16.msra.mxu0 %v2112_v47  ;;  %2177 = vmatpush1.bf16.msra.mxu1 %v2176_v48  ;;  %v2782_v47 = vpack.c.bf16 %v557_v46, %v553_v45  ;;  %v560_v48 = vld [vmem:[#allocation5 + $0x48] sm:$0xff]  ;;  %v2804_v6 = vpack.c.bf16 %v580_v4, %v576_v3 }
  0x5e   :  { %2115 = vmatprep.subr.bf16.mxu0 %v2114_v49  ;;  %2179 = vmatprep.subr.bf16.mxu1 %v2178_v53  ;;  %v564_v49 = vld [vmem:[#allocation5 + $0x68] sm:$0xff]  ;;  %v563_v53 = vld [vmem:[#allocation5 + $0x60] sm:$0xff] }
  0x5f   :  { %v2786_v51 = vpack.c.bf16 %v564_v49, %v560_v48  ;;  %v2789_v55 = vpack.c.bf16 %v563_v53, %v559_v52 }
  0x61   :  { %2117 = vmatpush1.bf16.msra.mxu0 %v2116_v59  ;;  %2181 = vmatpush1.bf16.msra.mxu1 %v2180_v60  ;;  %v2791_v59 = vpack.c.bf16 %v566_v54, %v562_v50  ;;  %v2794_v60 = vpack.c.bf16 %v572_v57, %v568_v56 }
  0x62   :  { %2119 = vmatprep.subr.bf16.mxu0 %v2118_v61  ;;  %2183 = vmatprep.subr.bf16.mxu1 %v2182_v1  ;;  %v571_v61 = vld [vmem:[#allocation5 + $0xa0] sm:$0xff] }
  0x63   :  { %v2798_v1 = vpack.c.bf16 %v571_v61, %v567_v58 }
  0x65   :  { %2121 = vmatpush1.bf16.msra.mxu0 %v2120_v7  ;;  %2185 = vmatpush1.bf16.msra.mxu1 %v2184_v8  ;;  %v579_v7 = vld [vmem:[#allocation5 + $0xe0] sm:$0xff]  ;;  %v570_v8 = vld [vmem:[#allocation5 + $0x98] sm:$0xff] }
  0x66   :  { %2123 = vmatprep.subr.bf16.mxu0 %v2122_v9  ;;  %2187 = vmatprep.subr.bf16.mxu1 %v2186_v12  ;;  %v574_v9 = vld [vmem:[#allocation5 + $0xb8] sm:$0xff]  ;;  %v573_v12 = vld [vmem:[#allocation5 + $0xb0] sm:$0xff] }
  0x67   :  { %v2808_v10 = vpack.c.bf16 %v574_v9, %v570_v8  ;;  %v2810_v14 = vpack.c.bf16 %v573_v12, %v569_v11 }
  0x69   :  { %2125 = vmatpush1.bf16.msra.mxu0 %v2124_v15  ;;  %2189 = vmatpush1.bf16.msra.mxu1 %v2188_v16  ;;  %v582_v15 = vld [vmem:[#allocation5 + $0xf8] sm:$0xff]  ;;  %v577_v16 = vld [vmem:[#allocation5 + $0xd0] sm:$0xff] }
  0x6a   :  { %2191 = vmatprep.subr.bf16.mxu0 %v2775_v39  ;;  %2207 = vmatprep.subr.bf16.mxu1 %v2779_v44 }
  0xa6   :  { %v119_v19 = vpop.permute.xlu0 %118  ;;  %v122_v20 = vpop.permute.xlu1 %121 }
  0xa7   :  { %vm141_vm0 = vcmp.eq.s32.totalorder %v2757_v18, %v119_v19  ;;  %vm142_vm1 = vcmp.eq.s32.totalorder %v2757_v18, %v122_v20  ;;  %v2816_v19 = vpack.c.bf16 %v582_v15, %v578_v13  ;;  %v2820_v20 = vpack.c.bf16 %v581_v17, %v577_v16 }
  0xa8   :  { %1962 = vmatprep.mubr.msk.f32.mxu0 %vm141_vm0, %v2646_v21  ;;  %1978 = vmatprep.mubr.msk.f32.mxu1 %vm141_vm0, %v2646_v21  ;;  %vm615_vm0 = vcmask 523264  }
  0xaa   :  { %v63_v22 = vpop.permute.xlu0 %62  ;;  %v66_v23 = vpop.permute.xlu1 %65 }
  0xab   :  { %vm85_vm2 = vcmp.eq.s32.totalorder %v2757_v18, %v63_v22  ;;  %vm86_vm3 = vcmp.eq.s32.totalorder %v2757_v18, %v66_v23 }
  0xac   :  { %1963 = vmatmul.mubr.msk.f32.vlgmr.msra.gmra.mrb[0].mxu0 %vm85_vm2, %v2646_v21  ;;  %1979 = vmatmul.mubr.msk.f32.vlgmr.msra.gmra.mrb[0].mxu1 %vm85_vm2, %v2646_v21 }
  0xad   :  { %1964 = vmatprep.mubr.msk.f32.mxu0 %vm142_vm1, %v2646_v21  ;;  %1980 = vmatprep.mubr.msk.f32.mxu1 %vm142_vm1, %v2646_v21  ;;  %vm2649_vm1 = vmmov 0  }
  0xae   :  { %v125_v24 = vpop.permute.xlu0 %124  ;;  %v69_v25 = vpop.permute.xlu1 %68  ;;  %2193 = vmatpush1.bf16.msra.mxu0 %v2777_v43  ;;  %2209 = vmatpush1.bf16.msra.mxu1 %v2782_v47 }
  0xaf   :  { %vm143_vm4 = vcmp.eq.s32.totalorder %v2757_v18, %v125_v24  ;;  %vm87_vm5 = vcmp.eq.s32.totalorder %v2757_v18, %v69_v25  ;;  %2195 = vmatprep.subr.bf16.mxu0 %v2786_v51  ;;  %2211 = vmatprep.subr.bf16.mxu1 %v2791_v59 }
  0xb0   :  { %1965 = vmatmul.mubr.msk.f32.gmra.mrb[2].mxu0 %vm86_vm3, %v2646_v21  ;;  %1981 = vmatmul.mubr.msk.f32.gmra.mrb[2].mxu1 %vm86_vm3, %v2646_v21 }
  0xb1   :  { %1966 = vmatprep.mubr.msk.f32.mxu0 %vm143_vm4, %v2646_v21  ;;  %1982 = vmatprep.mubr.msk.f32.mxu1 %vm143_vm4, %v2646_v21 }
  0xb2   :  { %v128_v26 = vpop.permute.xlu0 %127  ;;  %v72_v27 = vpop.permute.xlu1 %71  ;;  %2197 = vmatpush1.bf16.msra.mxu0 %v2789_v55  ;;  %2213 = vmatpush1.bf16.msra.mxu1 %v2801_v2 }
  0xb3   :  { %vm144_vm6 = vcmp.eq.s32.totalorder %v2757_v18, %v128_v26  ;;  %vm88_vm7 = vcmp.eq.s32.totalorder %v2757_v18, %v72_v27  ;;  %2199 = vmatprep.subr.bf16.mxu0 %v2794_v60  ;;  %2215 = vmatprep.subr.bf16.mxu1 %v2808_v10 }
  0xb4   :  { %1967 = vmatmul.mubr.msk.f32.gmra.mrb[4].mxu0 %vm87_vm5, %v2646_v21  ;;  %1983 = vmatmul.mubr.msk.f32.gmra.mrb[4].mxu1 %vm87_vm5, %v2646_v21 }
  0xb5   :  { %1968 = vmatprep.mubr.msk.f32.mxu0 %vm144_vm6, %v2646_v21  ;;  %1984 = vmatprep.mubr.msk.f32.mxu1 %vm144_vm6, %v2646_v21 }
  0xb6   :  { %v131_v28 = vpop.permute.xlu0 %130  ;;  %v75_v29 = vpop.permute.xlu1 %74  ;;  %2201 = vmatpush1.bf16.msra.mxu0 %v2798_v1  ;;  %2217 = vmatpush1.bf16.msra.mxu1 %v2810_v14 }
  0xb7   :  { %vm145_vm8 = vcmp.eq.s32.totalorder %v2757_v18, %v131_v28  ;;  %vm89_vm9 = vcmp.eq.s32.totalorder %v2757_v18, %v75_v29  ;;  %2203 = vmatprep.subr.bf16.mxu0 %v2804_v6  ;;  %2219 = vmatprep.subr.bf16.mxu1 %v2816_v19 }
  0xb8   :  { %1969 = vmatmul.mubr.msk.f32.gmra.mrb[6].mxu0 %vm88_vm7, %v2646_v21  ;;  %1985 = vmatmul.mubr.msk.f32.gmra.mrb[6].mxu1 %vm88_vm7, %v2646_v21 }
  0xb9   :  { %1970 = vmatprep.mubr.msk.f32.mxu0 %vm145_vm8, %v2646_v21  ;;  %1986 = vmatprep.mubr.msk.f32.mxu1 %vm145_vm8, %v2646_v21 }
  0xba   :  { %v134_v30 = vpop.permute.xlu0 %133  ;;  %v78_v31 = vpop.permute.xlu1 %77  ;;  %2221 = vmatpush1.bf16.msra.mxu1 %v2820_v20 }
  0xbb   :  { %vm146_vm10 = vcmp.eq.s32.totalorder %v2757_v18, %v134_v30  ;;  %vm90_vm11 = vcmp.eq.s32.totalorder %v2757_v18, %v78_v31  ;;  %2239 = vmatprep.subr.bf16.mxu1 %v2779_v44 }
  0xbc   :  { %1971 = vmatmul.mubr.msk.f32.gmra.mrb[8].mxu0 %vm89_vm9, %v2646_v21  ;;  %1987 = vmatmul.mubr.msk.f32.gmra.mrb[8].mxu1 %vm89_vm9, %v2646_v21 }
  0xbd   :  { %1972 = vmatprep.mubr.msk.f32.mxu0 %vm146_vm10, %v2646_v21  ;;  %1988 = vmatprep.mubr.msk.f32.mxu1 %vm146_vm10, %v2646_v21 }
  0xbe   :  { %v137_v32 = vpop.permute.xlu0 %136  ;;  %v81_v33 = vpop.permute.xlu1 %80 }
  0xbf   :  { %vm147_vm12 = vcmp.eq.s32.totalorder %v2757_v18, %v137_v32  ;;  %vm91_vm13 = vcmp.eq.s32.totalorder %v2757_v18, %v81_v33 }
  0xc0   :  { %1973 = vmatmul.mubr.msk.f32.gmra.mrb[10].mxu0 %vm90_vm11, %v2646_v21  ;;  %1989 = vmatmul.mubr.msk.f32.gmra.mrb[10].mxu1 %vm90_vm11, %v2646_v21 }
  0xc1   :  { %1974 = vmatprep.mubr.msk.f32.mxu0 %vm147_vm12, %v2646_v21  ;;  %1990 = vmatprep.mubr.msk.f32.mxu1 %vm147_vm12, %v2646_v21 }
  0xc2   :  { %v140_v34 = vpop.permute.xlu0 %139 }
  0xc3   :  { %vm148_vm14 = vcmp.eq.s32.totalorder %v2757_v18, %v140_v34 }
  0xc4   :  { %1975 = vmatmul.mubr.msk.f32.gmra.mrb[12].mxu0 %vm91_vm13, %v2646_v21  ;;  %1991 = vmatmul.mubr.msk.f32.gmra.mrb[12].mxu1 %vm91_vm13, %v2646_v21 }
  0xc5   :  { %1976 = vmatprep.mubr.msk.f32.mxu0 %vm148_vm14, %v2646_v21  ;;  %1992 = vmatprep.mubr.msk.f32.mxu1 %vm148_vm14, %v2646_v21 }
  0xca   :  { %v84_v35 = vpop.permute.xlu1 %83 }
  0xcb   :  { %vm92_vm15 = vcmp.eq.s32.totalorder %v2757_v18, %v84_v35  ;;  %v2813_v18 = vpack.c.bf16 %v579_v7, %v575_v5 }
  0xcc   :  { %1977 = vmatmul.mubr.msk.f32.gmra.mrb[14].mxu0 %vm92_vm15, %v2646_v21  ;;  %1993 = vmatmul.mubr.msk.f32.gmra.mrb[14].mxu1 %vm92_vm15, %v2646_v21 }
  0xcd   :  { %683 = vmatprep.mubr.f32.mxu0 %v2647_v0  ;;  %754 = vmatprep.mubr.f32.mxu1 %v2647_v0 }
  0xce   :  { %2205 = vmatpush1.bf16.msra.mxu0 %v2813_v18 }
  0xcf   :  { %2223 = vmatprep.subr.bf16.mxu0 %v2775_v39 }
 0x17f   :  { %v359_v21 = vpop.f32.mrb[0].mxu0  ;;  %v472_v22 = vpop.f32.mrb[0].mxu1 }
 0x180   :  { %v1994_v23 = vmul.f32 -1.442695, %v359_v21  ;;  %v361_v24 = vpop.f32.mrb[1].mxu0  ;;  %v474_v25 = vpop.f32.mrb[1].mxu1  ;;  %v1996_v27 = vmul.f32 -1.442695, %v472_v22 }
 0x181   :  { %v1995_v26 = vmul.f32 -1.442695, %v361_v24 }
 0x182   :  { %2465 = vpow2.f32 %v1994_v23 }
 0x183   :  { %2467 = vpow2.f32 %v1995_v26 }
 0x184   :  { %2469 = vtanh.f32 %v474_v25 }
 0x185   :  { %2471 = vpow2.f32 %v1996_v27 }
 0x18c   :  { %v2466_v28 = vpop.eup %2465 }
 0x18d   :  { %v596_v29 = vadd.f32 1.0, %v2466_v28  ;;  %v2468_v30 = vpop.eup %2467 }
 0x18e   :  { %v597_v31 = vadd.f32 1.0, %v2468_v30  ;;  %v2470_v32 = vpop.eup %2469 }
 0x18f   :  { %2473 = vrcp.f32 %v596_v29  ;;  %v2472_v33 = vpop.eup %2471 }
 0x190   :  { %2475 = vrcp.f32 %v597_v31  ;;  %v598_v37 = vadd.f32 1.0, %v2472_v33 }
 0x192   :  { %2477 = vrcp.f32 %v598_v37 }
 0x199   :  { %v2474_v34 = vpop.eup %2473 }
 0x19a   :  { %v607_v35 = vmul.f32 %v2474_v34, %v2470_v32  ;;  %v2476_v36 = vpop.eup %2475 }
 0x19b   :  { %v606_v38 = vmul.f32 0.0, %v2476_v36 }
 0x19c   :  { %v2478_v41 = vpop.eup %2477 }
 0x19d   :  { %v608_v40 = vadd.f32 %v607_v35, %v606_v38 }
 0x19f   :  { %2479 = vtanh.f32 %v608_v40 }
 0x1a9   :  { %v2480_v42 = vpop.eup %2479 }
 0x1aa   :  { %v610_v45 = vmul.f32 %v2480_v42, %v2478_v41 }
 0x1ac   :  { %1997 = vmatmul.mubr.msk.f32.vlgmr.msra.gmra.mrb[2].mxu0 %vm615_vm0, %v610_v45  ;;  %1998 = vmatmul.mubr.msk.f32.vlgmr.msra.gmra.mrb[2].mxu1 %vm615_vm0, %v610_v45 }
 0x1ad   :  { %2225 = vmatpush1.bf16.msra.mxu0 %v2777_v43  ;;  %2241 = vmatpush1.bf16.msra.mxu1 %v2782_v47 }
 0x1ae   :  { %2227 = vmatprep.subr.bf16.mxu0 %v2786_v51  ;;  %2243 = vmatprep.subr.bf16.mxu1 %v2791_v59 }
 0x1af   :  { %860 = vmatprep.mubr.f32.mxu0 %v2647_v0  ;;  %931 = vmatprep.mubr.f32.mxu1 %v2647_v0 }
 0x1b1   :  { %2229 = vmatpush1.bf16.msra.mxu0 %v2789_v55  ;;  %2245 = vmatpush1.bf16.msra.mxu1 %v2801_v2 }
 0x1b2   :  { %2231 = vmatprep.subr.bf16.mxu0 %v2794_v60  ;;  %2247 = vmatprep.subr.bf16.mxu1 %v2808_v10 }
 0x1b5   :  { %2233 = vmatpush1.bf16.msra.mxu0 %v2798_v1  ;;  %2249 = vmatpush1.bf16.msra.mxu1 %v2810_v14 }
 0x1b6   :  { %2235 = vmatprep.subr.bf16.mxu0 %v2804_v6  ;;  %2251 = vmatprep.subr.bf16.mxu1 %v2816_v19 }
 0x1b9   :  { %2237 = vmatpush1.bf16.msra.mxu0 %v2813_v18  ;;  %2253 = vmatpush1.bf16.msra.mxu1 %v2820_v20 }
 0x1ba   :  { %2255 = vmatprep.subr.bf16.mxu0 %v2775_v39  ;;  %2271 = vmatprep.subr.bf16.mxu1 %v2779_v44 }
 0x27f   :  { %v685_v46 = vpop.f32.mrb[2].mxu0  ;;  %v756_v48 = vpop.f32.mrb[2].mxu1 }
 0x280   :  { %v1999_v49 = vmul.f32 -1.442695, %v685_v46  ;;  %v687_v50 = vpop.f32.mrb[3].mxu0  ;;  %v758_v52 = vpop.f32.mrb[3].mxu1  ;;  %v2001_v54 = vmul.f32 -1.442695, %v756_v48 }
 0x281   :  { %v2000_v53 = vmul.f32 -1.442695, %v687_v50 }
 0x282   :  { %2481 = vpow2.f32 %v1999_v49 }
 0x283   :  { %2483 = vpow2.f32 %v2000_v53 }
 0x284   :  { %2485 = vtanh.f32 %v758_v52 }
 0x285   :  { %2487 = vpow2.f32 %v2001_v54 }
 0x28c   :  { %v2482_v56 = vpop.eup %2481 }
 0x28d   :  { %v774_v57 = vadd.f32 1.0, %v2482_v56  ;;  %v2484_v58 = vpop.eup %2483 }
 0x28e   :  { %v775_v61 = vadd.f32 1.0, %v2484_v58  ;;  %v2486_v62 = vpop.eup %2485 }
 0x28f   :  { %2489 = vrcp.f32 %v774_v57  ;;  %v2488_v63 = vpop.eup %2487 }
 0x290   :  { %2491 = vrcp.f32 %v775_v61  ;;  %v776_v7 = vadd.f32 1.0, %v2488_v63 }
 0x292   :  { %2493 = vrcp.f32 %v776_v7 }
 0x299   :  { %v2490_v3 = vpop.eup %2489 }
 0x29a   :  { %v785_v4 = vmul.f32 %v2490_v3, %v2486_v62  ;;  %v2492_v5 = vpop.eup %2491 }
 0x29b   :  { %v784_v8 = vmul.f32 %v2492_v5, %v608_v40 }
 0x29c   :  { %v2494_v11 = vpop.eup %2493 }
 0x29d   :  { %v786_v9 = vadd.f32 %v785_v4, %v784_v8 }
 0x29f   :  { %2495 = vtanh.f32 %v786_v9 }
 0x2a9   :  { %v2496_v12 = vpop.eup %2495 }
 0x2aa   :  { %v788_v13 = vmul.f32 %v2496_v12, %v2494_v11 }
 0x2ac   :  { %2002 = vmatmul.mubr.msk.f32.vlgmr.msra.gmra.mrb[4].mxu0 %vm615_vm0, %v788_v13  ;;  %2003 = vmatmul.mubr.msk.f32.vlgmr.msra.gmra.mrb[4].mxu1 %vm615_vm0, %v788_v13 }
 0x2ad   :  { %2257 = vmatpush1.bf16.msra.mxu0 %v2777_v43  ;;  %2273 = vmatpush1.bf16.msra.mxu1 %v2782_v47 }
 0x2ae   :  { %2259 = vmatprep.subr.bf16.mxu0 %v2786_v51  ;;  %2275 = vmatprep.subr.bf16.mxu1 %v2791_v59 }
 0x2af   :  { %1037 = vmatprep.mubr.f32.mxu0 %v2647_v0  ;;  %1108 = vmatprep.mubr.f32.mxu1 %v2647_v0 }
 0x2b1   :  { %2261 = vmatpush1.bf16.msra.mxu0 %v2789_v55  ;;  %2277 = vmatpush1.bf16.msra.mxu1 %v2801_v2 }
 0x2b2   :  { %2263 = vmatprep.subr.bf16.mxu0 %v2794_v60  ;;  %2279 = vmatprep.subr.bf16.mxu1 %v2808_v10 }
 0x2b5   :  { %2265 = vmatpush1.bf16.msra.mxu0 %v2798_v1  ;;  %2281 = vmatpush1.bf16.msra.mxu1 %v2810_v14 }
 0x2b6   :  { %2267 = vmatprep.subr.bf16.mxu0 %v2804_v6  ;;  %2283 = vmatprep.subr.bf16.mxu1 %v2816_v19 }
 0x2b9   :  { %2269 = vmatpush1.bf16.msra.mxu0 %v2813_v18  ;;  %2285 = vmatpush1.bf16.msra.mxu1 %v2820_v20 }
 0x2ba   :  { %2287 = vmatprep.subr.bf16.mxu0 %v2775_v39  ;;  %2303 = vmatprep.subr.bf16.mxu1 %v2779_v44 }
 0x37f   :  { %v862_v15 = vpop.f32.mrb[4].mxu0  ;;  %v933_v16 = vpop.f32.mrb[4].mxu1 }
 0x380   :  { %v2004_v17 = vmul.f32 -1.442695, %v862_v15  ;;  %v864_v21 = vpop.f32.mrb[5].mxu0  ;;  %v935_v22 = vpop.f32.mrb[5].mxu1  ;;  %v2006_v24 = vmul.f32 -1.442695, %v933_v16 }
 0x381   :  { %v2005_v23 = vmul.f32 -1.442695, %v864_v21 }
 0x382   :  { %2497 = vpow2.f32 %v2004_v17 }
 0x383   :  { %2499 = vpow2.f32 %v2005_v23 }
 0x384   :  { %2501 = vtanh.f32 %v935_v22 }
 0x385   :  { %2503 = vpow2.f32 %v2006_v24 }
 0x38c   :  { %v2498_v25 = vpop.eup %2497 }
 0x38d   :  { %v951_v26 = vadd.f32 1.0, %v2498_v25  ;;  %v2500_v27 = vpop.eup %2499 }
 0x38e   :  { %v952_v28 = vadd.f32 1.0, %v2500_v27  ;;  %v2502_v29 = vpop.eup %2501 }
 0x38f   :  { %2505 = vrcp.f32 %v951_v26  ;;  %v2504_v30 = vpop.eup %2503 }
 0x390   :  { %2507 = vrcp.f32 %v952_v28  ;;  %v953_v34 = vadd.f32 1.0, %v2504_v30 }
 0x392   :  { %2509 = vrcp.f32 %v953_v34 }
 0x399   :  { %v2506_v31 = vpop.eup %2505 }
 0x39a   :  { %v962_v32 = vmul.f32 %v2506_v31, %v2502_v29  ;;  %v2508_v33 = vpop.eup %2507 }
 0x39b   :  { %v961_v35 = vmul.f32 %v2508_v33, %v786_v9 }
 0x39c   :  { %v2510_v37 = vpop.eup %2509 }
 0x39d   :  { %v963_v36 = vadd.f32 %v962_v32, %v961_v35 }
 0x39f   :  { %2511 = vtanh.f32 %v963_v36 }
 0x3a9   :  { %v2512_v38 = vpop.eup %2511 }
 0x3aa   :  { %v965_v40 = vmul.f32 %v2512_v38, %v2510_v37 }
 0x3ac   :  { %2007 = vmatmul.mubr.msk.f32.vlgmr.msra.gmra.mrb[6].mxu0 %vm615_vm0, %v965_v40  ;;  %2008 = vmatmul.mubr.msk.f32.vlgmr.msra.gmra.mrb[6].mxu1 %vm615_vm0, %v965_v40 }
 0x3ad   :  { %2289 = vmatpush1.bf16.msra.mxu0 %v2777_v43  ;;  %2305 = vmatpush1.bf16.msra.mxu1 %v2782_v47 }
 0x3ae   :  { %2291 = vmatprep.subr.bf16.mxu0 %v2786_v51  ;;  %2307 = vmatprep.subr.bf16.mxu1 %v2791_v59 }
 0x3af   :  { %1214 = vmatprep.mubr.f32.mxu0 %v2647_v0  ;;  %1285 = vmatprep.mubr.f32.mxu1 %v2647_v0 }
 0x3b1   :  { %2293 = vmatpush1.bf16.msra.mxu0 %v2789_v55  ;;  %2309 = vmatpush1.bf16.msra.mxu1 %v2801_v2 }
 0x3b2   :  { %2295 = vmatprep.subr.bf16.mxu0 %v2794_v60  ;;  %2311 = vmatprep.subr.bf16.mxu1 %v2808_v10 }
 0x3b5   :  { %2297 = vmatpush1.bf16.msra.mxu0 %v2798_v1  ;;  %2313 = vmatpush1.bf16.msra.mxu1 %v2810_v14 }
 0x3b6   :  { %2299 = vmatprep.subr.bf16.mxu0 %v2804_v6  ;;  %2315 = vmatprep.subr.bf16.mxu1 %v2816_v19 }
 0x3b9   :  { %2301 = vmatpush1.bf16.msra.mxu0 %v2813_v18  ;;  %2317 = vmatpush1.bf16.msra.mxu1 %v2820_v20 }
 0x3ba   :  { %2319 = vmatprep.subr.bf16.mxu0 %v2775_v39  ;;  %2335 = vmatprep.subr.bf16.mxu1 %v2779_v44 }
 0x47f   :  { %v1039_v41 = vpop.f32.mrb[6].mxu0  ;;  %v1110_v42 = vpop.f32.mrb[6].mxu1 }
 0x480   :  { %v2009_v45 = vmul.f32 -1.442695, %v1039_v41  ;;  %v1041_v46 = vpop.f32.mrb[7].mxu0  ;;  %v1112_v48 = vpop.f32.mrb[7].mxu1  ;;  %v2011_v50 = vmul.f32 -1.442695, %v1110_v42 }
 0x481   :  { %v2010_v49 = vmul.f32 -1.442695, %v1041_v46 }
 0x482   :  { %2513 = vpow2.f32 %v2009_v45 }
 0x483   :  { %2515 = vpow2.f32 %v2010_v49 }
 0x484   :  { %2517 = vtanh.f32 %v1112_v48 }
 0x485   :  { %2519 = vpow2.f32 %v2011_v50 }
 0x48c   :  { %v2514_v52 = vpop.eup %2513 }
 0x48d   :  { %v1128_v53 = vadd.f32 1.0, %v2514_v52  ;;  %v2516_v54 = vpop.eup %2515 }
 0x48e   :  { %v1129_v56 = vadd.f32 1.0, %v2516_v54  ;;  %v2518_v57 = vpop.eup %2517 }
 0x48f   :  { %2521 = vrcp.f32 %v1128_v53  ;;  %v2520_v58 = vpop.eup %2519 }
 0x490   :  { %2523 = vrcp.f32 %v1129_v56  ;;  %v1130_v3 = vadd.f32 1.0, %v2520_v58 }
 0x492   :  { %2525 = vrcp.f32 %v1130_v3 }
 0x499   :  { %v2522_v61 = vpop.eup %2521 }
 0x49a   :  { %v1139_v62 = vmul.f32 %v2522_v61, %v2518_v57  ;;  %v2524_v63 = vpop.eup %2523 }
 0x49b   :  { %v1138_v4 = vmul.f32 %v2524_v63, %v963_v36 }
 0x49c   :  { %v2526_v7 = vpop.eup %2525 }
 0x49d   :  { %v1140_v5 = vadd.f32 %v1139_v62, %v1138_v4 }
 0x49f   :  { %2527 = vtanh.f32 %v1140_v5 }
 0x4a9   :  { %v2528_v8 = vpop.eup %2527 }
 0x4aa   :  { %v1142_v9 = vmul.f32 %v2528_v8, %v2526_v7 }
 0x4ac   :  { %2012 = vmatmul.mubr.msk.f32.vlgmr.msra.gmra.mrb[8].mxu0 %vm615_vm0, %v1142_v9  ;;  %2013 = vmatmul.mubr.msk.f32.vlgmr.msra.gmra.mrb[8].mxu1 %vm615_vm0, %v1142_v9 }
 0x4ad   :  { %2321 = vmatpush1.bf16.msra.mxu0 %v2777_v43  ;;  %2337 = vmatpush1.bf16.msra.mxu1 %v2782_v47 }
 0x4ae   :  { %2323 = vmatprep.subr.bf16.mxu0 %v2786_v51  ;;  %2339 = vmatprep.subr.bf16.mxu1 %v2791_v59 }
 0x4af   :  { %1391 = vmatprep.mubr.f32.mxu0 %v2647_v0  ;;  %1462 = vmatprep.mubr.f32.mxu1 %v2647_v0 }
 0x4b1   :  { %2325 = vmatpush1.bf16.msra.mxu0 %v2789_v55  ;;  %2341 = vmatpush1.bf16.msra.mxu1 %v2801_v2 }
 0x4b2   :  { %2327 = vmatprep.subr.bf16.mxu0 %v2794_v60  ;;  %2343 = vmatprep.subr.bf16.mxu1 %v2808_v10 }
 0x4b5   :  { %2329 = vmatpush1.bf16.msra.mxu0 %v2798_v1  ;;  %2345 = vmatpush1.bf16.msra.mxu1 %v2810_v14 }
 0x4b6   :  { %2331 = vmatprep.subr.bf16.mxu0 %v2804_v6  ;;  %2347 = vmatprep.subr.bf16.mxu1 %v2816_v19 }
 0x4b9   :  { %2333 = vmatpush1.bf16.msra.mxu0 %v2813_v18  ;;  %2349 = vmatpush1.bf16.msra.mxu1 %v2820_v20 }
 0x4ba   :  { %2351 = vmatprep.subr.bf16.mxu0 %v2775_v39  ;;  %2367 = vmatprep.subr.bf16.mxu1 %v2779_v44 }
 0x57f   :  { %v1216_v11 = vpop.f32.mrb[8].mxu0  ;;  %v1287_v12 = vpop.f32.mrb[8].mxu1 }
 0x580   :  { %v2014_v13 = vmul.f32 -1.442695, %v1216_v11  ;;  %v1218_v15 = vpop.f32.mrb[9].mxu0  ;;  %v1289_v16 = vpop.f32.mrb[9].mxu1  ;;  %v2016_v21 = vmul.f32 -1.442695, %v1287_v12 }
 0x581   :  { %v2015_v17 = vmul.f32 -1.442695, %v1218_v15  ;;  %v1851_v15 = vld [vmem:[%s2983_s4] sm:$0xff] }
 0x582   :  { %2529 = vpow2.f32 %v2014_v13 }
 0x583   :  { %2531 = vpow2.f32 %v2015_v17 }
 0x584   :  { %2533 = vtanh.f32 %v1289_v16  ;;  %v1852_v16 = vld [vmem:[%s2983_s4 + $0x8] sm:$0xff] }
 0x585   :  { %2535 = vpow2.f32 %v2016_v21  ;;  %v2415_v17 = vpack.c.bf16 %v1852_v16, %v1851_v15  ;;  %v2648_v21 = vmov 0.0|0.0  }
 0x58c   :  { %v2530_v22 = vpop.eup %2529 }
 0x58d   :  { %v1305_v23 = vadd.f32 1.0, %v2530_v22  ;;  %v2532_v24 = vpop.eup %2531  ;;  %v1853_v22 = vld [vmem:[%s2983_s4 + $0x10] sm:$0xff] }
 0x58e   :  { %v1306_v25 = vadd.f32 1.0, %v2532_v24  ;;  %v2534_v26 = vpop.eup %2533 }
 0x58f   :  { %2537 = vrcp.f32 %v1305_v23  ;;  %v2536_v27 = vpop.eup %2535  ;;  %v1854_v23 = vld [vmem:[%s2983_s4 + $0x18] sm:$0xff] }
 0x590   :  { %2539 = vrcp.f32 %v1306_v25  ;;  %v1307_v31 = vadd.f32 1.0, %v2536_v27  ;;  %v2418_v24 = vpack.c.bf16 %v1854_v23, %v1853_v22  ;;  %v1855_v25 = vld [vmem:[%s2983_s4 + $0x20] sm:$0xff] }
 0x592   :  { %2541 = vrcp.f32 %v1307_v31 }
 0x599   :  { %v2538_v28 = vpop.eup %2537 }
 0x59a   :  { %v1316_v29 = vmul.f32 %v2538_v28, %v2534_v26  ;;  %v2540_v30 = vpop.eup %2539  ;;  %v1856_v26 = vld [vmem:[%s2983_s4 + $0x28] sm:$0xff]  ;;  %v1857_v28 = vld [vmem:[%s2983_s4 + $0x30] sm:$0xff] }
 0x59b   :  { %v1315_v32 = vmul.f32 %v2540_v30, %v1140_v5  ;;  %v2421_v27 = vpack.c.bf16 %v1856_v26, %v1855_v25 }
 0x59c   :  { %v2542_v34 = vpop.eup %2541 }
 0x59d   :  { %v1317_v33 = vadd.f32 %v1316_v29, %v1315_v32  ;;  %v1858_v29 = vld [vmem:[%s2983_s4 + $0x38] sm:$0xff] }
 0x59e   :  { %v2424_v30 = vpack.c.bf16 %v1858_v29, %v1857_v28 }
 0x59f   :  { %2543 = vtanh.f32 %v1317_v33 }
 0x5a9   :  { %v2544_v35 = vpop.eup %2543 }
 0x5aa   :  { %v1319_v36 = vmul.f32 %v2544_v35, %v2542_v34 }
 0x5ac   :  { %2017 = vmatmul.mubr.msk.f32.vlgmr.msra.gmra.mrb[10].mxu0 %vm615_vm0, %v1319_v36  ;;  %2018 = vmatmul.mubr.msk.f32.vlgmr.msra.gmra.mrb[10].mxu1 %vm615_vm0, %v1319_v36 }
 0x5ad   :  { %2353 = vmatpush1.bf16.msra.mxu0 %v2777_v43  ;;  %2369 = vmatpush1.bf16.msra.mxu1 %v2782_v47 }
 0x5ae   :  { %2355 = vmatprep.subr.bf16.mxu0 %v2786_v51  ;;  %2371 = vmatprep.subr.bf16.mxu1 %v2791_v59 }
 0x5af   :  { %1568 = vmatprep.mubr.f32.mxu0 %v2647_v0  ;;  %1639 = vmatprep.mubr.f32.mxu1 %v2647_v0 }
 0x5b1   :  { %2357 = vmatpush1.bf16.msra.mxu0 %v2789_v55  ;;  %2373 = vmatpush1.bf16.msra.mxu1 %v2801_v2 }
 0x5b2   :  { %2359 = vmatprep.subr.bf16.mxu0 %v2794_v60  ;;  %2375 = vmatprep.subr.bf16.mxu1 %v2808_v10 }
 0x5b5   :  { %2361 = vmatpush1.bf16.msra.mxu0 %v2798_v1  ;;  %2377 = vmatpush1.bf16.msra.mxu1 %v2810_v14 }
 0x5b6   :  { %2363 = vmatprep.subr.bf16.mxu0 %v2804_v6  ;;  %2379 = vmatprep.subr.bf16.mxu1 %v2816_v19 }
 0x5b9   :  { %2365 = vmatpush1.bf16.msra.mxu0 %v2813_v18  ;;  %2381 = vmatpush1.bf16.msra.mxu1 %v2820_v20 }
 0x5ba   :  { %2383 = vmatprep.subr.bf16.mxu0 %v2775_v39  ;;  %2399 = vmatprep.subr.bf16.mxu1 %v2779_v44 }
 0x67f   :  { %v1393_v37 = vpop.f32.mrb[10].mxu0  ;;  %v1464_v38 = vpop.f32.mrb[10].mxu1 }
 0x680   :  { %v2019_v40 = vmul.f32 -1.442695, %v1393_v37  ;;  %v1395_v41 = vpop.f32.mrb[11].mxu0  ;;  %v1466_v42 = vpop.f32.mrb[11].mxu1  ;;  %v2021_v46 = vmul.f32 -1.442695, %v1464_v38 }
 0x681   :  { %v2020_v45 = vmul.f32 -1.442695, %v1395_v41 }
 0x682   :  { %2545 = vpow2.f32 %v2019_v40 }
 0x683   :  { %2547 = vpow2.f32 %v2020_v45 }
 0x684   :  { %2549 = vtanh.f32 %v1466_v42 }
 0x685   :  { %2551 = vpow2.f32 %v2021_v46 }
 0x68c   :  { %v2546_v48 = vpop.eup %2545 }
 0x68d   :  { %v1482_v49 = vadd.f32 1.0, %v2546_v48  ;;  %v2548_v50 = vpop.eup %2547 }
 0x68e   :  { %v1483_v52 = vadd.f32 1.0, %v2548_v50  ;;  %v2550_v39 = vpop.eup %2549 }
 0x68f   :  { %2553 = vrcp.f32 %v1482_v49  ;;  %v2552_v53 = vpop.eup %2551 }
 0x690   :  { %2555 = vrcp.f32 %v1483_v52  ;;  %v1484_v57 = vadd.f32 1.0, %v2552_v53 }
 0x692   :  { %2557 = vrcp.f32 %v1484_v57 }
 0x699   :  { %v2554_v44 = vpop.eup %2553 }
 0x69a   :  { %v1493_v54 = vmul.f32 %v2554_v44, %v2550_v39  ;;  %v2556_v56 = vpop.eup %2555 }
 0x69b   :  { %v1492_v58 = vmul.f32 %v2556_v56, %v1317_v33  ;;  %v2032_v56 = vld [vmem:[%s2984_s5] ss:$0 sm:$0xff] }
 0x69c   :  { %v2558_v62 = vpop.eup %2557 }
 0x69d   :  { %v1494_v61 = vadd.f32 %v1493_v54, %v1492_v58 }
 0x69f   :  { %2559 = vtanh.f32 %v1494_v61 }
 0x6a9   :  { %v2560_v63 = vpop.eup %2559 }
 0x6aa   :  { %v1496_v3 = vmul.f32 %v2560_v63, %v2558_v62 }
 0x6ac   :  { %2022 = vmatmul.mubr.msk.f32.vlgmr.msra.gmra.mrb[12].mxu0 %vm615_vm0, %v1496_v3  ;;  %2023 = vmatmul.mubr.msk.f32.vlgmr.msra.gmra.mrb[12].mxu1 %vm615_vm0, %v1496_v3 }
 0x6ad   :  { %2385 = vmatpush1.bf16.msra.mxu0 %v2777_v43  ;;  %2401 = vmatpush1.bf16.msra.mxu1 %v2782_v47 }
 0x6ae   :  { %2387 = vmatprep.subr.bf16.mxu0 %v2786_v51  ;;  %2403 = vmatprep.subr.bf16.mxu1 %v2791_v59 }
 0x6af   :  { %1745 = vmatprep.mubr.f32.mxu0 %v2647_v0  ;;  %1816 = vmatprep.mubr.f32.mxu1 %v2647_v0 }
 0x6b1   :  { %2389 = vmatpush1.bf16.msra.mxu0 %v2789_v55  ;;  %2405 = vmatpush1.bf16.msra.mxu1 %v2801_v2 }
 0x6b2   :  { %2391 = vmatprep.subr.bf16.mxu0 %v2794_v60  ;;  %2407 = vmatprep.subr.bf16.mxu1 %v2808_v10 }
 0x6b5   :  { %2393 = vmatpush1.bf16.msra.mxu0 %v2798_v1  ;;  %2409 = vmatpush1.bf16.msra.mxu1 %v2810_v14 }
 0x6b6   :  { %2395 = vmatprep.subr.bf16.mxu0 %v2804_v6  ;;  %2411 = vmatprep.subr.bf16.mxu1 %v2816_v19 }
 0x6b9   :  { %2397 = vmatpush1.bf16.msra.mxu0 %v2813_v18  ;;  %2413 = vmatpush1.bf16.msra.mxu1 %v2820_v20 }
 0x6ba   :  { %2414 = vmatprep.subr.bf16.mxu0 %v2648_v21 }
 0x77f   :  { %v1570_v43 = vpop.f32.mrb[12].mxu0  ;;  %v1641_v47 = vpop.f32.mrb[12].mxu1 }
 0x780   :  { %v2024_v51 = vmul.f32 -1.442695, %v1570_v43  ;;  %v1572_v55 = vpop.f32.mrb[13].mxu0  ;;  %v1643_v59 = vpop.f32.mrb[13].mxu1  ;;  %v2026_v2 = vmul.f32 -1.442695, %v1641_v47 }
 0x781   :  { %v2025_v60 = vmul.f32 -1.442695, %v1572_v55 }
 0x782   :  { %2561 = vpow2.f32 %v2024_v51 }
 0x783   :  { %2563 = vpow2.f32 %v2025_v60 }
 0x784   :  { %2565 = vtanh.f32 %v1643_v59 }
 0x785   :  { %2567 = vpow2.f32 %v2026_v2 }
 0x78c   :  { %v2562_v1 = vpop.eup %2561 }
 0x78d   :  { %v1659_v10 = vadd.f32 1.0, %v2562_v1  ;;  %v2564_v14 = vpop.eup %2563 }
 0x78e   :  { %v1660_v6 = vadd.f32 1.0, %v2564_v14  ;;  %v2566_v18 = vpop.eup %2565 }
 0x78f   :  { %2569 = vrcp.f32 %v1659_v10  ;;  %v2568_v19 = vpop.eup %2567 }
 0x790   :  { %2571 = vrcp.f32 %v1660_v6  ;;  %v1661_v7 = vadd.f32 1.0, %v2568_v19 }
 0x792   :  { %2573 = vrcp.f32 %v1661_v7 }
 0x799   :  { %v2570_v20 = vpop.eup %2569 }
 0x79a   :  { %v1670_v4 = vmul.f32 %v2570_v20, %v2566_v18  ;;  %v2572_v5 = vpop.eup %2571 }
 0x79b   :  { %v1669_v8 = vmul.f32 %v2572_v5, %v1494_v61 }
 0x79c   :  { %v2574_v11 = vpop.eup %2573 }
 0x79d   :  { %v1671_v9 = vadd.f32 %v1670_v4, %v1669_v8 }
 0x79f   :  { %2575 = vtanh.f32 %v1671_v9 }
 0x7a9   :  { %v2576_v12 = vpop.eup %2575 }
 0x7aa   :  { %v1673_v13 = vmul.f32 %v2576_v12, %v2574_v11 }
 0x7ac   :  { %2027 = vmatmul.mubr.msk.f32.vlgmr.msra.gmra.mrb[14].mxu0 %vm615_vm0, %v1673_v13  ;;  %2028 = vmatmul.mubr.msk.f32.vlgmr.msra.gmra.mrb[14].mxu1 %vm615_vm0, %v1673_v13 }
 0x7ad   :  { %2416 = vmatpush3.bf16.msra.mxu0 %v2415_v17  ;;  %2059 = vmatprep.mubr.msk.f32.mxu0 %vm2649_vm1, %v2647_v0 }
 0x7ae   :  { %2417 = vmatprep.subr.bf16.mxu0 %v2648_v21 }
 0x7b1   :  { %2419 = vmatpush3.bf16.msra.mxu0 %v2418_v24 }
 0x7b2   :  { %2420 = vmatprep.subr.bf16.mxu0 %v2648_v21 }
 0x7b5   :  { %2422 = vmatpush3.bf16.msra.mxu0 %v2421_v27 }
 0x7b6   :  { %2423 = vmatprep.subr.bf16.mxu0 %v2648_v21 }
 0x7b9   :  { %2425 = vmatpush3.bf16.msra.mxu0 %v2424_v30 }
 0x87f   :  { %v1747_v31 = vpop.f32.mrb[14].mxu0  ;;  %v1818_v32 = vpop.f32.mrb[14].mxu1 }
 0x880   :  { %v2029_v33 = vmul.f32 -1.442695, %v1747_v31  ;;  %v1749_v34 = vpop.f32.mrb[15].mxu0  ;;  %v1820_v0 = vpop.f32.mrb[15].mxu1  ;;  %v2031_v36 = vmul.f32 -1.442695, %v1818_v32 }
 0x881   :  { %v2030_v35 = vmul.f32 -1.442695, %v1749_v34 }
 0x882   :  { %2577 = vpow2.f32 %v2029_v33 }
 0x883   :  { %2579 = vpow2.f32 %v2030_v35 }
 0x884   :  { %2581 = vtanh.f32 %v1820_v0 }
 0x885   :  { %2583 = vpow2.f32 %v2031_v36 }
 0x88c   :  { %v2578_v37 = vpop.eup %2577 }
 0x88d   :  { %v1836_v38 = vadd.f32 1.0, %v2578_v37  ;;  %v2580_v40 = vpop.eup %2579 }
 0x88e   :  { %v1837_v41 = vadd.f32 1.0, %v2580_v40  ;;  %v2582_v42 = vpop.eup %2581 }
 0x88f   :  { %2585 = vrcp.f32 %v1836_v38  ;;  %v2584_v45 = vpop.eup %2583 }
 0x890   :  { %2587 = vrcp.f32 %v1837_v41  ;;  %v1838_v50 = vadd.f32 1.0, %v2584_v45 }
 0x892   :  { %2589 = vrcp.f32 %v1838_v50 }
 0x899   :  { %v2586_v46 = vpop.eup %2585 }
 0x89a   :  { %v1847_v48 = vmul.f32 %v2586_v46, %v2582_v42  ;;  %v2588_v49 = vpop.eup %2587 }
 0x89b   :  { %v1846_v52 = vmul.f32 %v2588_v49, %v1671_v9 }
 0x89c   :  { %v2590_v53 = vpop.eup %2589 }
 0x89d   :  { %v1848_v39 = vadd.f32 %v1847_v48, %v1846_v52 }
 0x89f   :  { %2591 = vtanh.f32 %v1848_v39 }
 0x8a9   :  { %v2592_v44 = vpop.eup %2591 }
 0x8aa   :  { %v1850_v54 = vmul.f32 %v2592_v44, %v2590_v53 }
 0x8ac   :  { %2060 = vmatmul.mubr.msk.f32.vlgmr.msra.gmra.mrb[16].mxu0 %vm615_vm0, %v1850_v54 }
 0x97f   :  { %v1935_v57 = vpop.f32.mrb[16].mxu0 }
 0x980   :  { %v1936_v58 = vadd.f32 %v2032_v56, %v1935_v57  ;;  %v2061_v61 = vpop.f32.mrb[17].mxu0 }
 0x982   :  { %1939 = vst [vmem:[%s2985_s6] sm:$0xff] %v1936_v58 }
 0x983   :  { %1944 = vsyncpa [#allocation4], 1 }
 0x984   :  { %1945 = vsyncpa [#allocation6], 1 }

</bundles_post_ra>
